<compile_context>
chip_gen: v7x
topology: tpu7x:2x2x1
jax: 0.10.0
libtpu: 0.0.40
codegen_flags: <defaults>
</compile_context>

<pallas_src>
import jax
import jax.numpy as jnp
from jax import lax
from jax.experimental import pallas as pl
from jax.experimental.pallas import tpu as pltpu


def _pointnet_kernel(x_ref, w1_ref, b1_ref, w2b_ref, b2_ref,
                     w3_ref, b3_ref, w4_ref, b4_ref, out_ref, acc_ref):
    """One (batch-tile, point-tile) grid step.

    x_ref:   (TB, 3, NT)      f32   native NCW slab, points on lanes
    w1_ref:  (3, 64, 1)       f32   layer-1 weight, one (64,1) column per input channel
    b1_ref:  (64, 1)          f32
    w2b_ref: (TB, 256, 64)    bf16  layer-2 weight pre-broadcast over the batch tile
    acc_ref: (TB, 256, 1)     f32   running max over point tiles (pre-bias h2)
    out_ref: (TB, C_pad)      f32   logits, written only at the last point tile
    """
    n_idx = pl.program_id(1)

    @pl.when(n_idx == 0)
    def _init():
        acc_ref[...] = jnp.full(acc_ref.shape, -jnp.inf, acc_ref.dtype)

    # mlp1 layer 1: Conv1d(3->64, k=1) + ReLU as three broadcast FMAs on the
    # VPU (K=3 would waste the MXU).  Result is lane-dense: (TB, 64, NT).
    h1 = (x_ref[:, 0:1, :] * w1_ref[0][None]
          + x_ref[:, 1:2, :] * w1_ref[1][None]
          + x_ref[:, 2:3, :] * w1_ref[2][None]
          + b1_ref[...][None])
    h1 = jnp.maximum(h1, 0.0).astype(jnp.bfloat16)            # (TB, 64, NT)

    # mlp1 layer 2: Conv1d(64->256, k=1) as a batched matmul on the MXU
    # (bf16 operands, f32 accumulation).  Bias + ReLU deferred past the pool.
    h2 = lax.dot_general(
        w2b_ref[...], h1,
        dimension_numbers=(((2,), (1,)), ((0,), (0,))),
        preferred_element_type=jnp.float32)                   # (TB, 256, NT)

    # MaxPool1d over this point tile (XLU lane-reduce), folded into the
    # per-batch-element running max.
    tile_max = jnp.max(h2, axis=-1, keepdims=True)            # (TB, 256, 1)
    acc_ref[...] = jnp.maximum(acc_ref[...], tile_max)

    @pl.when(n_idx == pl.num_programs(1) - 1)
    def _finalize():
        TB, F, _ = acc_ref.shape
        # Deferred bias + ReLU of layer 2, applied after the max over all N
        # points (exact).  Tiny one-off relayout to (TB, 256) lane-major.
        pooled = jnp.maximum(acc_ref[...].reshape(TB, F) + b2_ref[...], 0.0)
        # mlp3: Linear(256->128) -> Dropout(p=0.3) [eval: identity] -> ReLU
        # TODO(synk): training-mode dropout masking is not reproduced here.
        h3 = jnp.dot(pooled, w3_ref[...], preferred_element_type=jnp.float32)
        h3 = jnp.maximum(h3 + b3_ref[...], 0.0)               # (TB, 128)
        logits = jnp.dot(h3, w4_ref[...], preferred_element_type=jnp.float32)
        out_ref[...] = logits + b4_ref[...]                   # (TB, C_pad)


def _default_batch_tile(B: int) -> int:
    """TB == B for small B; otherwise a multiple-of-8 divisor of B that leaves
    at least two batch tiles (so the 'parallel' axis feeds both v7x cores)."""
    if B < 16:
        return B
    best = None
    for d in range(8, min(B // 2, 64) + 1, 8):
        if B % d == 0:
            best = d
    return best if best is not None else B


def _default_point_tile(N: int, TB: int, target_rows: int = 8192) -> int:
    """Largest multiple-of-128 divisor of N with TB*NT roughly <= target_rows.

    NT sits on the lane axis, so it must be a multiple of 128 or the full N
    (Mosaic block constraint).  target_rows=8192 bounds the per-step h2 tile
    to <= 8 MiB f32, which fits v7x's 64 MiB VMEM with headroom; on v5e/v6e
    (128 MiB) you can pass a larger point_tile explicitly.
    """
    cap = max(128, target_rows // max(TB, 1))
    if N <= cap:
        return N
    if N % 128 != 0:
        # Lane blocks must be 128-aligned or the full axis; fall back to full.
        return N
    best = 128
    d = 128
    while d <= cap:
        if N % d == 0:
            best = d
        d += 128
    return best


def mini_pointnet_forward(x_ncw, params, num_classes, *, batch_tile=None,
                          point_tile=None, vmem_limit_bytes=40 * 1024 * 1024):
    """x_ncw: (B, 3, N) float32, exactly like the PyTorch module's input."""
    B, Cin, N = x_ncw.shape
    assert Cin == 3
    assert N % 8 == 0, f"Number of points must be divisible by 8: {N}"

    w1, b1, w2, b2, w3, b3, w4, b4 = params   # PyTorch-native shapes

    TB = batch_tile if batch_tile is not None else _default_batch_tile(B)
    assert B % TB == 0 and (TB == B or TB % 8 == 0), (B, TB)
    NT = point_tile if point_tile is not None else _default_point_tile(N, TB)
    assert N % NT == 0 and (NT == N or NT % 128 == 0), (N, NT)

    # Lane-dense classifier head: pad num_classes up to a multiple of 128.
    C_pad = max(128, ((num_classes + 127) // 128) * 128)
    w4t = jnp.zeros((128, C_pad), jnp.float32).at[:, :num_classes].set(w4.T)
    b4p = jnp.zeros((1, C_pad), jnp.float32).at[:, :num_classes].set(b4[None, :])

    # Tiny weight-only layout prep (x itself stays in native NCW layout).
    w1k = w1.reshape(64, 3).T.reshape(3, 64, 1)                    # (3, 64, 1)
    b1k = b1.reshape(64, 1)
    w2b = jnp.broadcast_to(
        w2.reshape(256, 64).astype(jnp.bfloat16)[None], (TB, 256, 64))
    b2k = b2.reshape(1, 256)
    w3t = w3.T                                                     # (256, 128)
    b3k = b3.reshape(1, 128)

    grid = (B // TB, N // NT)

    def full(a):
        zeros = (0,) * a.ndim
        return pl.BlockSpec(a.shape, lambda bi, ni: zeros)

    out = pl.pallas_call(
        _pointnet_kernel,
        out_shape=jax.ShapeDtypeStruct((B, C_pad), jnp.float32),
        grid_spec=pltpu.PrefetchScalarGridSpec(
            num_scalar_prefetch=0,
            grid=grid,
            in_specs=[
                pl.BlockSpec((TB, 3, NT), lambda bi, ni: (bi, 0, ni)),   # x
                full(w1k), full(b1k),
                full(w2b), full(b2k),
                full(w3t), full(b3k),
                full(w4t), full(b4p),
            ],
            out_specs=pl.BlockSpec((TB, C_pad), lambda bi, ni: (bi, 0)),
            scratch_shapes=[pltpu.VMEM((TB, 256, 1), jnp.float32)],
        ),
        compiler_params=pltpu.CompilerParams(
            dimension_semantics=("parallel", "arbitrary"),
            vmem_limit_bytes=vmem_limit_bytes,
        ),
    )(x_ncw, w1k, b1k, w2b, b2k, w3t, b3k, w4t, b4p)

    return out[:, :num_classes]


def init_params(key, num_classes):
    """Deterministic synthetic parameters in PyTorch-native (squeezed) shapes:
      Conv1d(3,64,1)   -> w1 (64,3),   b1 (64,)
      Conv1d(64,256,1) -> w2 (256,64), b2 (256,)
      Linear(256,128)  -> w3 (128,256),b3 (128,)
      Linear(128,C)    -> w4 (C,128),  b4 (C,)
    """
    ks = jax.random.split(key, 8)

    def u(k, shape, fan_in):
        bound = 1.0 / jnp.sqrt(fan_in)
        return jax.random.uniform(k, shape, jnp.float32, -bound, bound)

    w1 = u(ks[0], (64, 3), 3)
    b1 = u(ks[1], (64,), 3)
    w2 = u(ks[2], (256, 64), 64)
    b2 = u(ks[3], (256,), 64)
    w3 = u(ks[4], (128, 256), 256)
    b3 = u(ks[5], (128,), 256)
    w4 = u(ks[6], (num_classes, 128), 128)
    b4 = u(ks[7], (num_classes,), 128)
    return (w1, b1, w2, b2, w3, b3, w4, b4)


def reference_forward(x_ncw, params):
    """Pure-JAX f32 reference (eval-mode dropout), matching the PyTorch module."""
    w1, b1, w2, b2, w3, b3, w4, b4 = params
    h1 = jnp.maximum(jnp.einsum('oc,bcn->bon', w1, x_ncw) + b1.reshape(1, 64, 1), 0.0)
    h2 = jnp.maximum(jnp.einsum('of,bfn->bon', w2, h1) + b2.reshape(1, 256, 1), 0.0)
    pooled = jnp.max(h2, axis=-1)                          # MaxPool1d(N) + reshape
    h3 = jnp.maximum(pooled @ w3.T + b3, 0.0)              # Dropout(p=0.3) eval = id
    return h3 @ w4.T + b4


def reference_forward_matched(x_ncw, params):
    """Reference mirroring the kernel's numerics (bf16 MXU feed for layer 2,
    deferred layer-2 bias/ReLU past the max-pool -- mathematically exact)."""
    w1, b1, w2, b2, w3, b3, w4, b4 = params
    h1 = (x_ncw[:, 0:1, :] * w1[:, 0][None, :, None]
          + x_ncw[:, 1:2, :] * w1[:, 1][None, :, None]
          + x_ncw[:, 2:3, :] * w1[:, 2][None, :, None]
          + b1.reshape(1, 64, 1))
    h1 = jnp.maximum(h1, 0.0).astype(jnp.bfloat16)
    h2 = jnp.einsum('of,bfn->bon', w2.astype(jnp.bfloat16), h1,
                    preferred_element_type=jnp.float32)
    pooled = jnp.maximum(jnp.max(h2, axis=-1) + b2[None, :], 0.0)
    h3 = jnp.maximum(pooled @ w3.T + b3[None, :], 0.0)
    return h3 @ w4.T + b4[None, :]


# TODO(synk): pool_function='avg' variant of the module is not implemented
# (module default 'max' is what this kernel reproduces).

if __name__ == "__main__":
    NUM_CLASSES = 10
    key = jax.random.PRNGKey(0)
    kx1, kx2, kp = jax.random.split(key, 3)
    params = init_params(kp, NUM_CLASSES)

    # Case 1: tiny shapes, default tiling (single batch tile, single point tile).
    B1, N1 = 2, 16
    x1 = jax.random.normal(kx1, (B1, 3, N1), dtype=jnp.float32)
    out1 = jax.block_until_ready(mini_pointnet_forward(x1, params, NUM_CLASSES))
    assert out1.shape == (B1, NUM_CLASSES)
    assert jnp.allclose(out1, reference_forward_matched(x1, params),
                        atol=2e-3, rtol=2e-3)
    assert jnp.allclose(out1, reference_forward(x1, params),
                        atol=3e-2, rtol=3e-2)

    # Case 2: two batch tiles x two point tiles -> exercises the running-max
    # accumulator, the pl.when init/finalize paths, and both grid axes.
    B2, N2 = 16, 256
    x2 = jax.random.normal(kx2, (B2, 3, N2), dtype=jnp.float32)
    out2 = jax.block_until_ready(
        mini_pointnet_forward(x2, params, NUM_CLASSES, batch_tile=8, point_tile=128))
    assert out2.shape == (B2, NUM_CLASSES)
    assert jnp.allclose(out2, reference_forward_matched(x2, params),
                        atol=2e-3, rtol=2e-3)
    assert jnp.allclose(out2, reference_forward(x2, params),
                        atol=3e-2, rtol=3e-2)

    print("KERNEL_OK")
</pallas_src>

<mosaic_0001>
module attributes {stable_mosaic.version = 11 : i64} {
  func.func @_pointnet_kernel(%arg0: i32, %arg1: i32, %arg2: memref<2x3x16xf32, #tpu.memory_space<vmem>>, %arg3: memref<3x64x1xf32, #tpu.memory_space<vmem>>, %arg4: memref<64x1xf32, #tpu.memory_space<vmem>>, %arg5: memref<2x256x64xbf16, #tpu.memory_space<vmem>>, %arg6: memref<1x256xf32, #tpu.memory_space<vmem>>, %arg7: memref<256x128xf32, #tpu.memory_space<vmem>>, %arg8: memref<1x128xf32, #tpu.memory_space<vmem>>, %arg9: memref<128x128xf32, #tpu.memory_space<vmem>>, %arg10: memref<1x128xf32, #tpu.memory_space<vmem>>, %arg11: memref<2x128xf32, #tpu.memory_space<vmem>>, %arg12: memref<2x256x1xf32, #tpu.memory_space<vmem>>) attributes {dimension_semantics = [#tpu.dimension_semantics<parallel>, #tpu.dimension_semantics<arbitrary>], iteration_bounds = array<i64: 1, 1>, scalar_prefetch = 0 : i64, scratch_operands = 1 : i64, tpu.core_type = #tpu.core_type<tc>, window_params = [{transform_indices = @transform_0, window_bounds = array<i64: 2, 3, 16>}, {pipeline_mode = #tpu.pipeline_mode<synchronous>, transform_indices = @transform_1, window_bounds = array<i64: 3, 64, 1>}, {pipeline_mode = #tpu.pipeline_mode<synchronous>, transform_indices = @transform_2, window_bounds = array<i64: 64, 1>}, {pipeline_mode = #tpu.pipeline_mode<synchronous>, transform_indices = @transform_3, window_bounds = array<i64: 2, 256, 64>}, {pipeline_mode = #tpu.pipeline_mode<synchronous>, transform_indices = @transform_4, window_bounds = array<i64: 1, 256>}, {pipeline_mode = #tpu.pipeline_mode<synchronous>, transform_indices = @transform_5, window_bounds = array<i64: 256, 128>}, {pipeline_mode = #tpu.pipeline_mode<synchronous>, transform_indices = @transform_6, window_bounds = array<i64: 1, 128>}, {pipeline_mode = #tpu.pipeline_mode<synchronous>, transform_indices = @transform_7, window_bounds = array<i64: 128, 128>}, {pipeline_mode = #tpu.pipeline_mode<synchronous>, transform_indices = @transform_8, window_bounds = array<i64: 1, 128>}, {transform_indices = @transform_9, window_bounds = array<i64: 2, 128>}]} {
    %c0_i32 = arith.constant 0 : i32
    %0 = arith.cmpi eq, %arg1, %c0_i32 : i32
    %1 = arith.extui %0 : i1 to i32
    %c0_i32_0 = arith.constant 0 : i32
    %2 = arith.cmpi ne, %1, %c0_i32_0 : i32
    scf.if %2 {
      %cst_31 = arith.constant 0xFF800000 : f32
      %43 = vector.broadcast %cst_31 : f32 to vector<2x256x1xf32>
      %c0_32 = arith.constant 0 : index
      %c0_33 = arith.constant 0 : index
      %c0_34 = arith.constant 0 : index
      %44 = vector.load %arg12[%c0_32, %c0_33, %c0_34] : memref<2x256x1xf32, #tpu.memory_space<vmem>>, vector<2x256x1xf32>
      tpu.vector_store %arg12[%c0_32, %c0_33, %c0_34], %43 {strides = array<i32>} : memref<2x256x1xf32, #tpu.memory_space<vmem>>, vector<2x256x1xf32>,
    } else {
    }
    %c0 = arith.constant 0 : index
    %c0_1 = arith.constant 0 : index
    %c0_2 = arith.constant 0 : index
    %3 = vector.load %arg2[%c0, %c0_1, %c0_2] : memref<2x3x16xf32, #tpu.memory_space<vmem>>, vector<2x1x16xf32>
    %c0_3 = arith.constant 0 : index
    %c0_4 = arith.constant 0 : index
    %c0_5 = arith.constant 0 : index
    %4 = vector.load %arg3[%c0_3, %c0_4, %c0_5] : memref<3x64x1xf32, #tpu.memory_space<vmem>>, vector<1x64x1xf32>
    %5 = vector.shape_cast %4 : vector<1x64x1xf32> to vector<64x1xf32>
    %6 = vector.shape_cast %5 : vector<64x1xf32> to vector<1x64x1xf32>
    %7 = vector.broadcast %3 : vector<2x1x16xf32> to vector<2x64x16xf32>
    %8 = vector.broadcast %6 : vector<1x64x1xf32> to vector<2x64x16xf32>
    %9 = arith.mulf %7, %8 : vector<2x64x16xf32>
    %c0_6 = arith.constant 0 : index
    %c1 = arith.constant 1 : index
    %c0_7 = arith.constant 0 : index
    %10 = vector.load %arg2[%c0_6, %c1, %c0_7] : memref<2x3x16xf32, #tpu.memory_space<vmem>>, vector<2x1x16xf32>
    %c1_8 = arith.constant 1 : index
    %c0_9 = arith.constant 0 : index
    %c0_10 = arith.constant 0 : index
    %11 = vector.load %arg3[%c1_8, %c0_9, %c0_10] : memref<3x64x1xf32, #tpu.memory_space<vmem>>, vector<1x64x1xf32>
    %12 = vector.shape_cast %11 : vector<1x64x1xf32> to vector<64x1xf32>
    %13 = vector.shape_cast %12 : vector<64x1xf32> to vector<1x64x1xf32>
    %14 = vector.broadcast %10 : vector<2x1x16xf32> to vector<2x64x16xf32>
    %15 = vector.broadcast %13 : vector<1x64x1xf32> to vector<2x64x16xf32>
    %16 = arith.mulf %14, %15 : vector<2x64x16xf32>
    %17 = arith.addf %9, %16 : vector<2x64x16xf32>
    %c0_11 = arith.constant 0 : index
    %c2 = arith.constant 2 : index
    %c0_12 = arith.constant 0 : index
    %18 = vector.load %arg2[%c0_11, %c2, %c0_12] : memref<2x3x16xf32, #tpu.memory_space<vmem>>, vector<2x1x16xf32>
    %c2_13 = arith.constant 2 : index
    %c0_14 = arith.constant 0 : index
    %c0_15 = arith.constant 0 : index
    %19 = vector.load %arg3[%c2_13, %c0_14, %c0_15] : memref<3x64x1xf32, #tpu.memory_space<vmem>>, vector<1x64x1xf32>
    %20 = vector.shape_cast %19 : vector<1x64x1xf32> to vector<64x1xf32>
    %21 = vector.shape_cast %20 : vector<64x1xf32> to vector<1x64x1xf32>
    %22 = vector.broadcast %18 : vector<2x1x16xf32> to vector<2x64x16xf32>
    %23 = vector.broadcast %21 : vector<1x64x1xf32> to vector<2x64x16xf32>
    %24 = arith.mulf %22, %23 : vector<2x64x16xf32>
    %25 = arith.addf %17, %24 : vector<2x64x16xf32>
    %c0_16 = arith.constant 0 : index
    %c0_17 = arith.constant 0 : index
    %26 = vector.load %arg4[%c0_16, %c0_17] : memref<64x1xf32, #tpu.memory_space<vmem>>, vector<64x1xf32>
    %27 = vector.shape_cast %26 : vector<64x1xf32> to vector<1x64x1xf32>
    %28 = vector.broadcast %27 : vector<1x64x1xf32> to vector<2x64x16xf32>
    %29 = arith.addf %25, %28 : vector<2x64x16xf32>
    %cst = arith.constant 0.000000e+00 : f32
    %30 = vector.broadcast %cst : f32 to vector<2x64x16xf32>
    %31 = arith.maximumf %29, %30 : vector<2x64x16xf32>
    %32 = arith.truncf %31 : vector<2x64x16xf32> to vector<2x64x16xbf16>
    %c0_18 = arith.constant 0 : index
    %c0_19 = arith.constant 0 : index
    %c0_20 = arith.constant 0 : index
    %33 = vector.load %arg5[%c0_18, %c0_19, %c0_20] : memref<2x256x64xbf16, #tpu.memory_space<vmem>>, vector<2x256x64xbf16>
    %cst_21 = arith.constant dense<0.000000e+00> : vector<2x256x16xf32>
    %34 = tpu.matmul %33, %32, %cst_21 {dimension_numbers = #tpu.dot_dimension_numbers<[2], [1], [1], [2], [0, 0, 0, 1, 1, 2], [0], [0]>} : vector<2x256x64xbf16>, vector<2x64x16xbf16>, vector<2x256x16xf32> -> vector<2x256x16xf32>
    %cst_22 = arith.constant dense<0xFF800000> : vector<2x256xf32>
    %35 = vector.multi_reduction <maximumf>, %34, %cst_22 [2] : vector<2x256x16xf32> to vector<2x256xf32>
    %36 = vector.shape_cast %35 : vector<2x256xf32> to vector<2x256x1xf32>
    %c0_23 = arith.constant 0 : index
    %c0_24 = arith.constant 0 : index
    %c0_25 = arith.constant 0 : index
    %37 = vector.load %arg12[%c0_23, %c0_24, %c0_25] : memref<2x256x1xf32, #tpu.memory_space<vmem>>, vector<2x256x1xf32>
    %38 = arith.maximumf %37, %36 : vector<2x256x1xf32>
    %c0_26 = arith.constant 0 : index
    %c0_27 = arith.constant 0 : index
    %c0_28 = arith.constant 0 : index
    %39 = vector.load %arg12[%c0_26, %c0_27, %c0_28] : memref<2x256x1xf32, #tpu.memory_space<vmem>>, vector<2x256x1xf32>
    tpu.vector_store %arg12[%c0_26, %c0_27, %c0_28], %38 {strides = array<i32>} : memref<2x256x1xf32, #tpu.memory_space<vmem>>, vector<2x256x1xf32>,
    %c0_i32_29 = arith.constant 0 : i32
    %40 = arith.cmpi eq, %arg1, %c0_i32_29 : i32
    %41 = arith.extui %40 : i1 to i32
    %c0_i32_30 = arith.constant 0 : i32
    %42 = arith.cmpi ne, %41, %c0_i32_30 : i32
    scf.if %42 {
      %c0_31 = arith.constant 0 : index
      %c0_32 = arith.constant 0 : index
      %c0_33 = arith.constant 0 : index
      %43 = vector.load %arg12[%c0_31, %c0_32, %c0_33] : memref<2x256x1xf32, #tpu.memory_space<vmem>>, vector<2x256x1xf32>
      %44 = vector.shape_cast %43 : vector<2x256x1xf32> to vector<2x256xf32>
      %c0_34 = arith.constant 0 : index
      %c0_35 = arith.constant 0 : index
      %45 = vector.load %arg6[%c0_34, %c0_35] : memref<1x256xf32, #tpu.memory_space<vmem>>, vector<1x256xf32>
      %46 = vector.broadcast %45 : vector<1x256xf32> to vector<2x256xf32>
      %47 = arith.addf %44, %46 : vector<2x256xf32>
      %cst_36 = arith.constant 0.000000e+00 : f32
      %48 = vector.broadcast %cst_36 : f32 to vector<2x256xf32>
      %49 = arith.maximumf %47, %48 : vector<2x256xf32>
      %c0_37 = arith.constant 0 : index
      %c0_38 = arith.constant 0 : index
      %50 = vector.load %arg7[%c0_37, %c0_38] : memref<256x128xf32, #tpu.memory_space<vmem>>, vector<256x128xf32>
      %cst_39 = arith.constant dense<0.000000e+00> : vector<2x128xf32>
      %51 = tpu.matmul %49, %50, %cst_39 {dimension_numbers = #tpu.dot_dimension_numbers<[1], [0], [0], [1], [0, 0, 1, 1], [], []>} : vector<2x256xf32>, vector<256x128xf32>, vector<2x128xf32> -> vector<2x128xf32>
      %c0_40 = arith.constant 0 : index
      %c0_41 = arith.constant 0 : index
      %52 = vector.load %arg8[%c0_40, %c0_41] : memref<1x128xf32, #tpu.memory_space<vmem>>, vector<1x128xf32>
      %53 = vector.broadcast %52 : vector<1x128xf32> to vector<2x128xf32>
      %54 = arith.addf %51, %53 : vector<2x128xf32>
      %cst_42 = arith.constant 0.000000e+00 : f32
      %55 = vector.broadcast %cst_42 : f32 to vector<2x128xf32>
      %56 = arith.maximumf %54, %55 : vector<2x128xf32>
      %c0_43 = arith.constant 0 : index
      %c0_44 = arith.constant 0 : index
      %57 = vector.load %arg9[%c0_43, %c0_44] : memref<128x128xf32, #tpu.memory_space<vmem>>, vector<128x128xf32>
      %cst_45 = arith.constant dense<0.000000e+00> : vector<2x128xf32>
      %58 = tpu.matmul %56, %57, %cst_45 {dimension_numbers = #tpu.dot_dimension_numbers<[1], [0], [0], [1], [0, 0, 1, 1], [], []>} : vector<2x128xf32>, vector<128x128xf32>, vector<2x128xf32> -> vector<2x128xf32>
      %c0_46 = arith.constant 0 : index
      %c0_47 = arith.constant 0 : index
      %59 = vector.load %arg10[%c0_46, %c0_47] : memref<1x128xf32, #tpu.memory_space<vmem>>, vector<1x128xf32>
      %60 = vector.broadcast %59 : vector<1x128xf32> to vector<2x128xf32>
      %61 = arith.addf %58, %60 : vector<2x128xf32>
      %c0_48 = arith.constant 0 : index
      %c0_49 = arith.constant 0 : index
      %62 = vector.load %arg11[%c0_48, %c0_49] : memref<2x128xf32, #tpu.memory_space<vmem>>, vector<2x128xf32>
      tpu.vector_store %arg11[%c0_48, %c0_49], %61 {strides = array<i32>} : memref<2x128xf32, #tpu.memory_space<vmem>>, vector<2x128xf32>,
    } else {
    }
    return
  }
  func.func @transform_0(%arg0: i32, %arg1: i32) -> (i32, i32, i32) {
    %c0_i32 = arith.constant 0 : i32
    %c0_i32_0 = arith.constant 0 : i32
    return %arg0, %c0_i32, %arg1 : i32, i32, i32
  }
  func.func @transform_1(%arg0: i32, %arg1: i32) -> (i32, i32, i32) {
    %c0_i32 = arith.constant 0 : i32
    %c0_i32_0 = arith.constant 0 : i32
    %c0_i32_1 = arith.constant 0 : i32
    %c0_i32_2 = arith.constant 0 : i32
    return %c0_i32, %c0_i32_0, %c0_i32_1 : i32, i32, i32
  }
  func.func @transform_2(%arg0: i32, %arg1: i32) -> (i32, i32) {
    %c0_i32 = arith.constant 0 : i32
    %c0_i32_0 = arith.constant 0 : i32
    %c0_i32_1 = arith.constant 0 : i32
    return %c0_i32, %c0_i32_0 : i32, i32
  }
  func.func @transform_3(%arg0: i32, %arg1: i32) -> (i32, i32, i32) {
    %c0_i32 = arith.constant 0 : i32
    %c0_i32_0 = arith.constant 0 : i32
    %c0_i32_1 = arith.constant 0 : i32
    %c0_i32_2 = arith.constant 0 : i32
    return %c0_i32, %c0_i32_0, %c0_i32_1 : i32, i32, i32
  }
  func.func @transform_4(%arg0: i32, %arg1: i32) -> (i32, i32) {
    %c0_i32 = arith.constant 0 : i32
    %c0_i32_0 = arith.constant 0 : i32
    %c0_i32_1 = arith.constant 0 : i32
    return %c0_i32, %c0_i32_0 : i32, i32
  }
  func.func @transform_5(%arg0: i32, %arg1: i32) -> (i32, i32) {
    %c0_i32 = arith.constant 0 : i32
    %c0_i32_0 = arith.constant 0 : i32
    %c0_i32_1 = arith.constant 0 : i32
    return %c0_i32, %c0_i32_0 : i32, i32
  }
  func.func @transform_6(%arg0: i32, %arg1: i32) -> (i32, i32) {
    %c0_i32 = arith.constant 0 : i32
    %c0_i32_0 = arith.constant 0 : i32
    %c0_i32_1 = arith.constant 0 : i32
    return %c0_i32, %c0_i32_0 : i32, i32
  }
  func.func @transform_7(%arg0: i32, %arg1: i32) -> (i32, i32) {
    %c0_i32 = arith.constant 0 : i32
    %c0_i32_0 = arith.constant 0 : i32
    %c0_i32_1 = arith.constant 0 : i32
    return %c0_i32, %c0_i32_0 : i32, i32
  }
  func.func @transform_8(%arg0: i32, %arg1: i32) -> (i32, i32) {
    %c0_i32 = arith.constant 0 : i32
    %c0_i32_0 = arith.constant 0 : i32
    %c0_i32_1 = arith.constant 0 : i32
    return %c0_i32, %c0_i32_0 : i32, i32
  }
  func.func @transform_9(%arg0: i32, %arg1: i32) -> (i32, i32) {
    %c0_i32 = arith.constant 0 : i32
    %c0_i32_0 = arith.constant 0 : i32
    return %arg0, %c0_i32 : i32, i32
  }
}

</mosaic_0001>

<bundles_post_ra>
// kernel: tpu_custom_call.1
= control target key start
LH: loop header
LB: loop body
LE: loop exit
PB: predicated region body
PF: predicated region fallthrough
CT: control target
= control target key end

     0   :  { %v3241_v2 = vmov 0   ;;  %s4592_s0 = inlined_call_operand.vmem [shape: f32[2,3,16], index: 0, kind: input, shape index: {}]   ;;  %s4593_s1 = inlined_call_operand.vmem [shape: f32[3,64,1], index: 1, kind: input, shape index: {}]   ;;  %s4594_s2 = inlined_call_operand.vmem [shape: f32[64,1], index: 2, kind: input, shape index: {}]   ;;  %s4595_s3 = inlined_call_operand.vmem [shape: bf16[2,256,64], index: 3, kind: input, shape index: {}]   ;;  %s4596_s4 = inlined_call_operand.vmem [shape: f32[1,256], index: 4, kind: input, shape index: {}]   ;;  %s4597_s5 = inlined_call_operand.vmem [shape: f32[256,128], index: 5, kind: input, shape index: {}]   ;;  %s4598_s6 = inlined_call_operand.vmem [shape: f32[1,128], index: 6, kind: input, shape index: {}]   ;;  %s4599_s7 = inlined_call_operand.vmem [shape: f32[128,128], index: 7, kind: input, shape index: {}]   ;;  %s4600_s8 = inlined_call_operand.vmem [shape: f32[1,128], index: 8, kind: input, shape index: {}]   ;;  %s4601_s9 = inlined_call_operand.hbm [shape: f32[2,128], index: 9, kind: output, shape index: {}]  }
   0x1   :  { %v2668_v0 = vld [vmem:[%s4593_s1 + $0x40] sm:$0xff]  ;;  %3024 = vset.pattern.permute.xlu1 %v3241_v2  ;;  %3023 = vset.pattern.permute.xlu0 %v3241_v2  ;;  %v2669_v3 = vld [vmem:[%s4593_s1 + $0x48] sm:$0xff]  ;;  %v108_v7 = vld [vmem:[%s4593_s1 + $0x18] sm:$0xff] }
   0x2   :  { %v105_v1 = vld [vmem:[%s4593_s1] sm:$0xff]  ;;  %198 = vperm.xlu1 %3024, %v2668_v0   ;;  %v106_v4 = vld [vmem:[%s4593_s1 + $0x8] sm:$0xff]  ;;  %v107_v8 = vld [vmem:[%s4593_s1 + $0x10] sm:$0xff] }
   0x3   :  { %123 = vperm.xlu0 %3023, %v105_v1   ;;  %v2679_v5 = vld [vmem:[%s4593_s1 + $0x88] sm:$0xff]  ;;  %v2678_v6 = vld [vmem:[%s4593_s1 + $0x80] sm:$0xff]  ;;  %v2671_v9 = vld [vmem:[%s4593_s1 + $0x58] sm:$0xff] }
   0x4   :  { %v2670_v10 = vld [vmem:[%s4593_s1 + $0x50] sm:$0xff]  ;;  %v2681_v11 = vld [vmem:[%s4593_s1 + $0x98] sm:$0xff]  ;;  %v360_v13 = vld [vmem:[%s4594_s2 + $0x8] sm:$0xff] }
   0x5   :  { %v2680_v12 = vld [vmem:[%s4593_s1 + $0x90] sm:$0xff]  ;;  %v359_v14 = vld [vmem:[%s4594_s2] sm:$0xff]  ;;  %v110_v15 = vld [vmem:[%s4593_s1 + $0x28] sm:$0xff] }
   0x6   :  { %203 = vperm.xlu1 %3024, %v2669_v3   ;;  %v109_v16 = vld [vmem:[%s4593_s1 + $0x20] sm:$0xff]  ;;  %v2673_v17 = vld [vmem:[%s4593_s1 + $0x68] sm:$0xff] }
   0x7   :  { %128 = vperm.xlu0 %3023, %v106_v4   ;;  %v2672_v18 = vld [vmem:[%s4593_s1 + $0x60] sm:$0xff] }
   0xa   :  { %294 = vperm.xlu1 %3024, %v2679_v5  }
   0xb   :  { %289 = vperm.xlu0 %3023, %v2678_v6  }
   0xe   :  { %138 = vperm.xlu1 %3024, %v108_v7  }
   0xf   :  { %133 = vperm.xlu0 %3023, %v107_v8  }
  0x12   :  { %213 = vperm.xlu1 %3024, %v2671_v9  }
  0x13   :  { %208 = vperm.xlu0 %3023, %v2670_v10  }
  0x16   :  { %304 = vperm.xlu1 %3024, %v2681_v11  }
  0x17   :  { %299 = vperm.xlu0 %3023, %v2680_v12  }
  0x1a   :  { %374 = vperm.xlu1 %3024, %v360_v13  }
  0x1b   :  { %369 = vperm.xlu0 %3023, %v359_v14  }
  0x1e   :  { %148 = vperm.xlu1 %3024, %v110_v15  }
  0x1f   :  { %143 = vperm.xlu0 %3023, %v109_v16  }
  0x22   :  { %223 = vperm.xlu1 %3024, %v2673_v17  }
  0x23   :  { %218 = vperm.xlu0 %3023, %v2672_v18  }
  0x24   :  { %14 = vsyncpa [#allocation4], 0  ;;  %v2683_v19 = vld [vmem:[%s4593_s1 + $0xa8] sm:$0xff]  ;;  %v2682_v20 = vld [vmem:[%s4593_s1 + $0xa0] sm:$0xff]  ;;  %vm591_vm0 = vcmask 523264   ;;  %v1545_v35 = vlaneseq  ;;  %vm1090_vm1 = vcmask 130048  }
  0x25   :  { %v362_v21 = vld [vmem:[%s4594_s2 + $0x18] sm:$0xff]  ;;  %v361_v22 = vld [vmem:[%s4594_s2 + $0x10] sm:$0xff]  ;;  %v364_v29 = vld [vmem:[%s4594_s2 + $0x28] sm:$0xff]  ;;  %vm38_vm2 = vcmask 7168   ;;  %vm2145_vm3 = vcmask 130112   ;;  %vm2152_vm4 = vcmask 195712  }
  0x26   :  { %314 = vperm.xlu1 %3024, %v2683_v19   ;;  %v112_v23 = vld [vmem:[%s4593_s1 + $0x38] sm:$0xff]  ;;  %v111_v24 = vld [vmem:[%s4593_s1 + $0x30] sm:$0xff]  ;;  %v363_v30 = vld [vmem:[%s4594_s2 + $0x20] sm:$0xff]  ;;  %v3402_v36 = vshrl.u32 %v1545_v35, 7  ;;  %vm2159_vm5 = vcmask 261312   ;;  %vm2166_vm6 = vcmask 326912  }
  0x27   :  { %309 = vperm.xlu0 %3023, %v2682_v20   ;;  %v2675_v25 = vld [vmem:[%s4593_s1 + $0x78] sm:$0xff]  ;;  %v2674_v26 = vld [vmem:[%s4593_s1 + $0x70] sm:$0xff]  ;;  %v3185_v33 = vld [vmem:[%s4595_s3] sm:$0xff]   ;;  %vm2173_vm7 = vcmask 392512   ;;  %vm2180_vm8 = vcmask 458112   ;;  %vm2187_vm9 = vcmask 523712  }
  0x28   :  { %v2685_v27 = vld [vmem:[%s4593_s1 + $0xb8] sm:$0xff]  ;;  %v2684_v28 = vld [vmem:[%s4593_s1 + $0xb0] sm:$0xff]  ;;  %v3186_v34 = vld [vmem:[%s4595_s3 + $0x80] sm:$0xff]   ;;  %2854 = vmatprep.mubr.msk.bf16.mxu0 %vm591_vm0, %v3185_v33  ;;  %v1551_v38 = vsub.s32 1, %v3402_v36  ;;  %v1547_v39 = vsub.s32 0, %v3402_v36  ;;  %vm2194_vm10 = vcmask 589312  }
  0x29   :  { %v366_v31 = vld [vmem:[%s4594_s2 + $0x38] sm:$0xff]  ;;  %v365_v32 = vld [vmem:[%s4594_s2 + $0x30] sm:$0xff]  ;;  %2894 = vmatprep.mubr.msk.bf16.mxu1 %vm591_vm0, %v3186_v34  ;;  %v1543_v37 = vld [vmem:[%s4596_s4] sm:$0x3]  ;;  %vm2201_vm11 = vcmask 654912   ;;  %vm2208_vm12 = vcmask 720512  }
  0x2a   :  { %384 = vperm.xlu1 %3024, %v362_v21   ;;  %v3409_v40 = vrot.slane %v1543_v37, %v1551_v38  ;;  %v3412_v41 = vrot.slane %v1543_v37, %v1547_v39  ;;  %v3426_v48 = vld [vmem:[%s4592_s0 + $0x1] ss:$0 sm:$0xff]  ;;  %v3437_v51 = vld [vmem:[%s4592_s0 + $0x5] ss:$0 sm:$0xff]  ;;  %v3442_v52 = vld [vmem:[%s4592_s0] ss:$0 sm:$0xff] }
  0x2b   :  { %379 = vperm.xlu0 %3023, %v361_v22   ;;  %v3447_v53 = vld [vmem:[%s4592_s0 + $0x4] ss:$0 sm:$0xff]  ;;  %v3456_v58 = vld [vmem:[%s4592_s0 + $0x2] ss:$0 sm:$0xff]  ;;  %v3461_v59 = vld [vmem:[%s4592_s0 + $0x6] ss:$0 sm:$0xff] }
  0x2c   :  { %vm2215_vm13 = vcmask 786112   ;;  %vm2222_vm14 = vcmask 851712   ;;  %vm2229_vm15 = vcmask 917312  }
  0x2e   :  { %158 = vperm.xlu1 %3024, %v112_v23  }
  0x2f   :  { %153 = vperm.xlu0 %3023, %v111_v24  }
  0x32   :  { %233 = vperm.xlu1 %3024, %v2675_v25  }
  0x33   :  { %228 = vperm.xlu0 %3023, %v2674_v26  }
  0x36   :  { %324 = vperm.xlu1 %3024, %v2685_v27  }
  0x37   :  { %319 = vperm.xlu0 %3023, %v2684_v28  }
  0x3a   :  { %394 = vperm.xlu1 %3024, %v364_v29  }
  0x3b   :  { %389 = vperm.xlu0 %3023, %v363_v30  }
  0x3e   :  { %404 = vperm.xlu1 %3024, %v366_v31  }
  0x3f   :  { %399 = vperm.xlu0 %3023, %v365_v32  }
  0x42   :  { %1617 = vbcast.lane.b32.xlu1 %v3409_v40, 256 }
  0x43   :  { %1621 = vbcast.lane.b32.xlu0 %v3409_v40, 264 }
  0x46   :  { %1554 = vbcast.lane.b32.xlu1 %v3412_v41, 256 }
  0x47   :  { %1625 = vbcast.lane.b32.xlu0 %v3409_v40, 272 }
  0x4a   :  { %1558 = vbcast.lane.b32.xlu1 %v3412_v41, 264 }
  0x4b   :  { %1629 = vbcast.lane.b32.xlu0 %v3409_v40, 280 }
  0x4e   :  { %1562 = vbcast.lane.b32.xlu1 %v3412_v41, 272 }
  0x4f   :  { %1633 = vbcast.lane.b32.xlu0 %v3409_v40, 288 }
  0x52   :  { %1566 = vbcast.lane.b32.xlu1 %v3412_v41, 280 }
  0x53   :  { %1637 = vbcast.lane.b32.xlu0 %v3409_v40, 296 }
  0x56   :  { %1570 = vbcast.lane.b32.xlu1 %v3412_v41, 288 }
  0x57   :  { %1641 = vbcast.lane.b32.xlu0 %v3409_v40, 304 }
  0x5a   :  { %1574 = vbcast.lane.b32.xlu1 %v3412_v41, 296 }
  0x5b   :  { %1645 = vbcast.lane.b32.xlu0 %v3409_v40, 312 }
  0x5e   :  { %1578 = vbcast.lane.b32.xlu1 %v3412_v41, 304 }
  0x5f   :  { %1649 = vbcast.lane.b32.xlu0 %v3409_v40, 320 }
  0x62   :  { %1582 = vbcast.lane.b32.xlu1 %v3412_v41, 312 }
  0x63   :  { %1653 = vbcast.lane.b32.xlu0 %v3409_v40, 328 }
  0x66   :  { %1586 = vbcast.lane.b32.xlu1 %v3412_v41, 320 }
  0x67   :  { %1657 = vbcast.lane.b32.xlu0 %v3409_v40, 336 }
  0x6a   :  { %1590 = vbcast.lane.b32.xlu1 %v3412_v41, 328 }
  0x6b   :  { %1661 = vbcast.lane.b32.xlu0 %v3409_v40, 344 }
  0x6e   :  { %1594 = vbcast.lane.b32.xlu1 %v3412_v41, 336 }
  0x6f   :  { %1665 = vbcast.lane.b32.xlu0 %v3409_v40, 352 }
  0x72   :  { %1598 = vbcast.lane.b32.xlu1 %v3412_v41, 344 }
  0x73   :  { %1669 = vbcast.lane.b32.xlu0 %v3409_v40, 360 }
  0x76   :  { %1602 = vbcast.lane.b32.xlu1 %v3412_v41, 352 }
  0x77   :  { %1673 = vbcast.lane.b32.xlu0 %v3409_v40, 368 }
  0x7a   :  { %1606 = vbcast.lane.b32.xlu1 %v3412_v41, 360 }
  0x81   :  { %v199_v42 = vpop.permute.xlu1 %198 }
  0x82   :  { %v124_v43 = vpop.permute.xlu0 %123  ;;  %v236_v54 = vmul.f32 %v3426_v48, %v199_v42  ;;  %v244_v55 = vmul.f32 %v3437_v51, %v199_v42 }
  0x83   :  { %v161_v56 = vmul.f32 %v3442_v52, %v124_v43  ;;  %v169_v57 = vmul.f32 %v3447_v53, %v124_v43 }
  0x85   :  { %v204_v44 = vpop.permute.xlu1 %203  ;;  %v252_v8 = vadd.f32 %v236_v54, %v161_v56  ;;  %v260_v9 = vadd.f32 %v244_v55, %v169_v57 }
  0x86   :  { %v129_v45 = vpop.permute.xlu0 %128  ;;  %v237_v62 = vmul.f32 %v3426_v48, %v204_v44  ;;  %v245_v63 = vmul.f32 %v3437_v51, %v204_v44 }
  0x87   :  { %v162_v0 = vmul.f32 %v3442_v52, %v129_v45  ;;  %v170_v1 = vmul.f32 %v3447_v53, %v129_v45 }
  0x89   :  { %v295_v46 = vpop.permute.xlu1 %294  ;;  %v253_v10 = vadd.f32 %v237_v62, %v162_v0  ;;  %v261_v11 = vadd.f32 %v245_v63, %v170_v1 }
  0x8a   :  { %v290_v47 = vpop.permute.xlu0 %289  ;;  %v328_v2 = vmul.f32 %v3456_v58, %v295_v46  ;;  %v336_v3 = vmul.f32 %v3461_v59, %v295_v46 }
  0x8b   :  { %v327_v4 = vmul.f32 %v3456_v58, %v290_v47  ;;  %v335_v5 = vmul.f32 %v3461_v59, %v290_v47 }
  0x8c   :  { %v344_v12 = vadd.f32 %v328_v2, %v253_v10  ;;  %v352_v13 = vadd.f32 %v336_v3, %v261_v11 }
  0x8d   :  { %v3428_v49 = vpop.permute.xlu1 %138  ;;  %v343_v14 = vadd.f32 %v327_v4, %v252_v8  ;;  %v351_v15 = vadd.f32 %v335_v5, %v260_v9 }
  0x8e   :  { %v3430_v50 = vpop.permute.xlu0 %133  ;;  %v164_v30 = vmul.f32 %v3442_v52, %v3428_v49  ;;  %v172_v39 = vmul.f32 %v3447_v53, %v3428_v49 }
  0x8f   :  { %v163_v42 = vmul.f32 %v3442_v52, %v3430_v50  ;;  %v171_v43 = vmul.f32 %v3447_v53, %v3430_v50 }
  0x91   :  { %v214_v60 = vpop.permute.xlu1 %213 }
  0x92   :  { %v209_v61 = vpop.permute.xlu0 %208  ;;  %v239_v33 = vmul.f32 %v3426_v48, %v214_v60  ;;  %v247_v34 = vmul.f32 %v3437_v51, %v214_v60 }
  0x93   :  { %v238_v37 = vmul.f32 %v3426_v48, %v209_v61  ;;  %v246_v38 = vmul.f32 %v3437_v51, %v209_v61 }
  0x94   :  { %v255_v55 = vadd.f32 %v239_v33, %v164_v30  ;;  %v263_v56 = vadd.f32 %v247_v34, %v172_v39 }
  0x95   :  { %v305_v6 = vpop.permute.xlu1 %304  ;;  %v254_v57 = vadd.f32 %v238_v37, %v163_v42  ;;  %v262_v60 = vadd.f32 %v246_v38, %v171_v43 }
  0x96   :  { %v300_v7 = vpop.permute.xlu0 %299  ;;  %v330_v44 = vmul.f32 %v3456_v58, %v305_v6  ;;  %v338_v45 = vmul.f32 %v3461_v59, %v305_v6 }
  0x97   :  { %v329_v46 = vmul.f32 %v3456_v58, %v300_v7  ;;  %v337_v47 = vmul.f32 %v3461_v59, %v300_v7 }
  0x98   :  { %v346_v50 = vadd.f32 %v330_v44, %v255_v55  ;;  %v354_v61 = vadd.f32 %v338_v45, %v263_v56 }
  0x99   :  { %v375_v16 = vpop.permute.xlu1 %374  ;;  %v345_v62 = vadd.f32 %v329_v46, %v254_v57  ;;  %v353_v63 = vadd.f32 %v337_v47, %v262_v60 }
  0x9a   :  { %v370_v17 = vpop.permute.xlu0 %369  ;;  %v408_v18 = vadd.f32 %v375_v16, %v344_v12  ;;  %v416_v19 = vadd.f32 %v375_v16, %v352_v13 }
  0x9b   :  { %v407_v20 = vadd.f32 %v370_v17, %v343_v14  ;;  %v415_v21 = vadd.f32 %v370_v17, %v351_v15 }
  0x9c   :  { %v424_v23 = vmax.f32 %v408_v18, 0.0  ;;  %v432_v25 = vmax.f32 %v416_v19, 0.0 }
  0x9d   :  { %v423_v22 = vmax.f32 %v407_v20, 0.0  ;;  %v431_v24 = vmax.f32 %v415_v21, 0.0  ;;  %v149_v26 = vpop.permute.xlu1 %148 }
  0x9e   :  { %v144_v27 = vpop.permute.xlu0 %143  ;;  %v166_v18 = vmul.f32 %v3442_v52, %v149_v26  ;;  %v174_v19 = vmul.f32 %v3447_v53, %v149_v26 }
  0x9f   :  { %v439_v28 = vpack.c.bf16 %v424_v23, %v423_v22  ;;  %v443_v29 = vpack.c.bf16 %v432_v25, %v431_v24  ;;  %v165_v20 = vmul.f32 %v3442_v52, %v144_v27  ;;  %v173_v21 = vmul.f32 %v3447_v53, %v144_v27 }
  0xa1   :  { %2846 = vmatprep.subr.bf16.mxu0 %v439_v28  ;;  %2886 = vmatprep.subr.bf16.mxu1 %v443_v29  ;;  %v224_v31 = vpop.permute.xlu1 %223 }
  0xa2   :  { %v219_v32 = vpop.permute.xlu0 %218  ;;  %2847 = vmatpush3.bf16.msra.mxu0 %v439_v28  ;;  %2887 = vmatpush3.bf16.msra.mxu1 %v443_v29  ;;  %v241_v12 = vmul.f32 %v3426_v48, %v224_v31  ;;  %v249_v13 = vmul.f32 %v3437_v51, %v224_v31 }
  0xa3   :  { %v240_v14 = vmul.f32 %v3426_v48, %v219_v32  ;;  %v248_v15 = vmul.f32 %v3437_v51, %v219_v32 }
  0xa4   :  { %v257_v24 = vadd.f32 %v241_v12, %v166_v18  ;;  %v265_v25 = vadd.f32 %v249_v13, %v174_v19 }
  0xa5   :  { %v315_v49 = vpop.permute.xlu1 %314  ;;  %v256_v28 = vadd.f32 %v240_v14, %v165_v20  ;;  %v264_v29 = vadd.f32 %v248_v15, %v173_v21 }
  0xa6   :  { %v310_v54 = vpop.permute.xlu0 %309  ;;  %v332_v30 = vmul.f32 %v3456_v58, %v315_v49  ;;  %v340_v26 = vmul.f32 %v3461_v59, %v315_v49 }
  0xa7   :  { %v331_v31 = vmul.f32 %v3456_v58, %v310_v54  ;;  %v339_v27 = vmul.f32 %v3461_v59, %v310_v54 }
  0xa8   :  { %v348_v54 = vadd.f32 %v332_v30, %v257_v24  ;;  %v3189_v24 = vld [vmem:[%s4595_s3 + $0x10] sm:$0xff]   ;;  %v3193_v30 = vld [vmem:[%s4595_s3 + $0x20] sm:$0xff]  }
  0xa9   :  { %v385_v0 = vpop.permute.xlu1 %384  ;;  %v347_v55 = vadd.f32 %v331_v31, %v256_v28  ;;  %v355_v56 = vadd.f32 %v339_v27, %v264_v29  ;;  %v3191_v28 = vld [vmem:[%s4595_s3 + $0x18] sm:$0xff]   ;;  %v3195_v31 = vld [vmem:[%s4595_s3 + $0x28] sm:$0xff]  }
  0xaa   :  { %v380_v1 = vpop.permute.xlu0 %379  ;;  %v410_v2 = vadd.f32 %v385_v0, %v346_v50  ;;  %v418_v3 = vadd.f32 %v385_v0, %v354_v61  ;;  %v3192_v29 = vld [vmem:[%s4595_s3 + $0x98] sm:$0xff]   ;;  %v3196_v27 = vld [vmem:[%s4595_s3 + $0xa8] sm:$0xff]  }
  0xab   :  { %v409_v4 = vadd.f32 %v380_v1, %v345_v62  ;;  %v417_v5 = vadd.f32 %v380_v1, %v353_v63 }
  0xac   :  { %v426_v6 = vmax.f32 %v410_v2, 0.0  ;;  %v434_v7 = vmax.f32 %v418_v3, 0.0 }
  0xad   :  { %v425_v8 = vmax.f32 %v409_v4, 0.0  ;;  %v433_v9 = vmax.f32 %v417_v5, 0.0  ;;  %v159_v10 = vpop.permute.xlu1 %158 }
  0xae   :  { %v154_v11 = vpop.permute.xlu0 %153  ;;  %v168_v42 = vmul.f32 %v3442_v52, %v159_v10  ;;  %v176_v43 = vmul.f32 %v3447_v53, %v159_v10 }
  0xaf   :  { %v440_v16 = vpack.c.bf16 %v426_v6, %v425_v8  ;;  %v444_v17 = vpack.c.bf16 %v434_v7, %v433_v9  ;;  %v167_v44 = vmul.f32 %v3442_v52, %v154_v11  ;;  %v175_v45 = vmul.f32 %v3447_v53, %v154_v11 }
  0xb1   :  { %2848 = vmatprep.subr.bf16.mxu0 %v440_v16  ;;  %2888 = vmatprep.subr.bf16.mxu1 %v444_v17  ;;  %v234_v22 = vpop.permute.xlu1 %233 }
  0xb2   :  { %v229_v23 = vpop.permute.xlu0 %228  ;;  %2849 = vmatpush3.bf16.msra.mxu0 %v440_v16  ;;  %2889 = vmatpush3.bf16.msra.mxu1 %v444_v17  ;;  %v243_v32 = vmul.f32 %v3426_v48, %v234_v22  ;;  %v251_v33 = vmul.f32 %v3437_v51, %v234_v22  ;;  %v3187_v22 = vld [vmem:[%s4595_s3 + $0x8] sm:$0xff]  }
  0xb3   :  { %v242_v34 = vmul.f32 %v3426_v48, %v229_v23  ;;  %v250_v37 = vmul.f32 %v3437_v51, %v229_v23  ;;  %v356_v51 = vadd.f32 %v340_v26, %v265_v25  ;;  %v3188_v23 = vld [vmem:[%s4595_s3 + $0x88] sm:$0xff]   ;;  %v3190_v25 = vld [vmem:[%s4595_s3 + $0x90] sm:$0xff]   ;;  %v3194_v26 = vld [vmem:[%s4595_s3 + $0xa0] sm:$0xff]  }
  0xb4   :  { %v259_v57 = vadd.f32 %v243_v32, %v168_v42  ;;  %v267_v60 = vadd.f32 %v251_v33, %v176_v43  ;;  %v3197_v32 = vld [vmem:[%s4595_s3 + $0x30] sm:$0xff]   ;;  %v3203_v42 = vld [vmem:[%s4595_s3 + $0x48] sm:$0xff]  }
  0xb5   :  { %v325_v38 = vpop.permute.xlu1 %324  ;;  %v258_v50 = vadd.f32 %v242_v34, %v167_v44  ;;  %v266_v61 = vadd.f32 %v250_v37, %v175_v45  ;;  %v3198_v33 = vld [vmem:[%s4595_s3 + $0xb0] sm:$0xff]   ;;  %v3199_v34 = vld [vmem:[%s4595_s3 + $0x38] sm:$0xff]   ;;  %v3204_v43 = vld [vmem:[%s4595_s3 + $0xc8] sm:$0xff]  }
  0xb6   :  { %v320_v39 = vpop.permute.xlu0 %319  ;;  %v334_v46 = vmul.f32 %v3456_v58, %v325_v38  ;;  %v342_v47 = vmul.f32 %v3461_v59, %v325_v38  ;;  %v3200_v37 = vld [vmem:[%s4595_s3 + $0xb8] sm:$0xff]   ;;  %v3201_v38 = vld [vmem:[%s4595_s3 + $0x40] sm:$0xff]   ;;  %v3205_v44 = vld [vmem:[%s4595_s3 + $0x50] sm:$0xff]  }
  0xb7   :  { %v333_v49 = vmul.f32 %v3456_v58, %v320_v39  ;;  %v341_v48 = vmul.f32 %v3461_v59, %v320_v39  ;;  %v3202_v39 = vld [vmem:[%s4595_s3 + $0xc0] sm:$0xff]   ;;  %v3207_v45 = vld [vmem:[%s4595_s3 + $0xd0] sm:$0xff]  }
  0xb8   :  { %v350_v2 = vadd.f32 %v334_v46, %v259_v57  ;;  %v358_v3 = vadd.f32 %v342_v47, %v267_v60  ;;  %v3206_v46 = vld [vmem:[%s4595_s3 + $0x58] sm:$0xff]  }
  0xb9   :  { %v395_v62 = vpop.permute.xlu1 %394  ;;  %v349_v4 = vadd.f32 %v333_v49, %v258_v50  ;;  %v357_v58 = vadd.f32 %v341_v48, %v266_v61  ;;  %v3208_v47 = vld [vmem:[%s4595_s3 + $0xd8] sm:$0xff]   ;;  %v3209_v49 = vld [vmem:[%s4595_s3 + $0x60] sm:$0xff]  }
  0xba   :  { %v390_v52 = vpop.permute.xlu0 %389  ;;  %v412_v63 = vadd.f32 %v395_v62, %v348_v54  ;;  %v420_v53 = vadd.f32 %v395_v62, %v356_v51  ;;  %v3211_v48 = vld [vmem:[%s4595_s3 + $0xe0] sm:$0xff]   ;;  %v3210_v54 = vld [vmem:[%s4595_s3 + $0x68] sm:$0xff]   ;;  %v3214_v57 = vld [vmem:[%s4595_s3 + $0x78] sm:$0xff]  }
  0xbb   :  { %v411_v0 = vadd.f32 %v390_v52, %v347_v55  ;;  %v419_v1 = vadd.f32 %v390_v52, %v355_v56  ;;  %v3212_v51 = vld [vmem:[%s4595_s3 + $0xe8] sm:$0xff]   ;;  %v3213_v55 = vld [vmem:[%s4595_s3 + $0x70] sm:$0xff]   ;;  %v3216_v60 = vld [vmem:[%s4595_s3 + $0xf8] sm:$0xff]  }
  0xbc   :  { %v428_v5 = vmax.f32 %v412_v63, 0.0  ;;  %v436_v59 = vmax.f32 %v420_v53, 0.0  ;;  %v3215_v56 = vld [vmem:[%s4595_s3 + $0xf0] sm:$0xff]  }
  0xbd   :  { %v427_v6 = vmax.f32 %v411_v0, 0.0  ;;  %v435_v7 = vmax.f32 %v419_v1, 0.0  ;;  %v405_v8 = vpop.permute.xlu1 %404 }
  0xbe   :  { %v400_v9 = vpop.permute.xlu0 %399  ;;  %v414_v10 = vadd.f32 %v405_v8, %v350_v2  ;;  %v422_v11 = vadd.f32 %v405_v8, %v358_v3 }
  0xbf   :  { %v413_v12 = vadd.f32 %v400_v9, %v349_v4  ;;  %v421_v13 = vadd.f32 %v400_v9, %v357_v58  ;;  %v441_v14 = vpack.c.bf16 %v428_v5, %v427_v6  ;;  %v445_v15 = vpack.c.bf16 %v436_v59, %v435_v7 }
  0xc0   :  { %v430_v16 = vmax.f32 %v414_v10, 0.0  ;;  %v438_v17 = vmax.f32 %v422_v11, 0.0  ;;  %v3242_v9 = vmov -inf  }
  0xc1   :  { %v429_v18 = vmax.f32 %v413_v12, 0.0  ;;  %v437_v19 = vmax.f32 %v421_v13, 0.0  ;;  %2850 = vmatprep.subr.bf16.mxu0 %v441_v14  ;;  %2890 = vmatprep.subr.bf16.mxu1 %v445_v15  ;;  %41 = vst.msk [vmem:[#allocation2 + $0x10] sm:$0xff] %vm38_vm2, %v3242_v9  ;;  %39 = vst.msk [vmem:[#allocation2] sm:$0xff] %vm38_vm2, %v3242_v9 }
  0xc2   :  { %2851 = vmatpush3.bf16.msra.mxu0 %v441_v14  ;;  %2891 = vmatpush3.bf16.msra.mxu1 %v445_v15  ;;  %40 = vst.msk [vmem:[#allocation2 + $0x8] sm:$0xff] %vm38_vm2, %v3242_v9  ;;  %42 = vst.msk [vmem:[#allocation2 + $0x18] sm:$0xff] %vm38_vm2, %v3242_v9 }
  0xc3   :  { %v442_v20 = vpack.c.bf16 %v430_v16, %v429_v18  ;;  %v446_v21 = vpack.c.bf16 %v438_v17, %v437_v19  ;;  %43 = vst.msk [vmem:[#allocation2 + $0x20] sm:$0xff] %vm38_vm2, %v3242_v9  ;;  %44 = vst.msk [vmem:[#allocation2 + $0x28] sm:$0xff] %vm38_vm2, %v3242_v9 }
  0xc4   :  { %45 = vst.msk [vmem:[#allocation2 + $0x30] sm:$0xff] %vm38_vm2, %v3242_v9  ;;  %46 = vst.msk [vmem:[#allocation2 + $0x38] sm:$0xff] %vm38_vm2, %v3242_v9 }
  0xc5   :  { %2852 = vmatprep.subr.bf16.mxu0 %v442_v20  ;;  %2892 = vmatprep.subr.bf16.mxu1 %v446_v21  ;;  %47 = vst.msk [vmem:[#allocation2 + $0x40] sm:$0xff] %vm38_vm2, %v3242_v9  ;;  %48 = vst.msk [vmem:[#allocation2 + $0x48] sm:$0xff] %vm38_vm2, %v3242_v9 }
  0xc6   :  { %2853 = vmatpush3.bf16.msra.mxu0 %v442_v20  ;;  %2893 = vmatpush3.bf16.msra.mxu1 %v446_v21  ;;  %49 = vst.msk [vmem:[#allocation2 + $0x50] sm:$0xff] %vm38_vm2, %v3242_v9  ;;  %50 = vst.msk [vmem:[#allocation2 + $0x58] sm:$0xff] %vm38_vm2, %v3242_v9 }
  0xc7   :  { %51 = vst.msk [vmem:[#allocation2 + $0x60] sm:$0xff] %vm38_vm2, %v3242_v9  ;;  %52 = vst.msk [vmem:[#allocation2 + $0x68] sm:$0xff] %vm38_vm2, %v3242_v9 }
  0xc8   :  { %53 = vst.msk [vmem:[#allocation2 + $0x70] sm:$0xff] %vm38_vm2, %v3242_v9  ;;  %54 = vst.msk [vmem:[#allocation2 + $0x78] sm:$0xff] %vm38_vm2, %v3242_v9 }
  0xc9   :  { %2855 = vmatmul.mubr.msk.bf16.vlgmr.msra.gmra.mrb[0].mxu0 %vm591_vm0, %v3187_v22  ;;  %2895 = vmatmul.mubr.msk.bf16.vlgmr.msra.gmra.mrb[0].mxu1 %vm591_vm0, %v3188_v23  ;;  %55 = vst.msk [vmem:[#allocation2 + $0x80] sm:$0xff] %vm38_vm2, %v3242_v9  ;;  %56 = vst.msk [vmem:[#allocation2 + $0x88] sm:$0xff] %vm38_vm2, %v3242_v9 }
  0xca   :  { %2858 = vmatprep.mubr.msk.bf16.mxu0 %vm591_vm0, %v3189_v24  ;;  %2898 = vmatprep.mubr.msk.bf16.mxu1 %vm591_vm0, %v3190_v25  ;;  %57 = vst.msk [vmem:[#allocation2 + $0x90] sm:$0xff] %vm38_vm2, %v3242_v9  ;;  %58 = vst.msk [vmem:[#allocation2 + $0x98] sm:$0xff] %vm38_vm2, %v3242_v9 }
  0xcb   :  { %59 = vst.msk [vmem:[#allocation2 + $0xa0] sm:$0xff] %vm38_vm2, %v3242_v9  ;;  %60 = vst.msk [vmem:[#allocation2 + $0xa8] sm:$0xff] %vm38_vm2, %v3242_v9 }
  0xcc   :  { %61 = vst.msk [vmem:[#allocation2 + $0xb0] sm:$0xff] %vm38_vm2, %v3242_v9  ;;  %62 = vst.msk [vmem:[#allocation2 + $0xb8] sm:$0xff] %vm38_vm2, %v3242_v9 }
  0xcd   :  { %63 = vst.msk [vmem:[#allocation2 + $0xc0] sm:$0xff] %vm38_vm2, %v3242_v9  ;;  %64 = vst.msk [vmem:[#allocation2 + $0xc8] sm:$0xff] %vm38_vm2, %v3242_v9 }
  0xce   :  { %65 = vst.msk [vmem:[#allocation2 + $0xd0] sm:$0xff] %vm38_vm2, %v3242_v9  ;;  %66 = vst.msk [vmem:[#allocation2 + $0xd8] sm:$0xff] %vm38_vm2, %v3242_v9 }
  0xcf   :  { %67 = vst.msk [vmem:[#allocation2 + $0xe0] sm:$0xff] %vm38_vm2, %v3242_v9  ;;  %68 = vst.msk [vmem:[#allocation2 + $0xe8] sm:$0xff] %vm38_vm2, %v3242_v9 }
  0xd0   :  { %69 = vst.msk [vmem:[#allocation2 + $0xf0] sm:$0xff] %vm38_vm2, %v3242_v9  ;;  %70 = vst.msk [vmem:[#allocation2 + $0xf8] sm:$0xff] %vm38_vm2, %v3242_v9 }
  0xd1   :  { %2859 = vmatmul.mubr.msk.bf16.gmra.mrb[4].mxu0 %vm591_vm0, %v3191_v28  ;;  %2899 = vmatmul.mubr.msk.bf16.gmra.mrb[4].mxu1 %vm591_vm0, %v3192_v29  ;;  %71 = vst.msk [vmem:[#allocation2 + $0x100] sm:$0xff] %vm38_vm2, %v3242_v9  ;;  %72 = vst.msk [vmem:[#allocation2 + $0x108] sm:$0xff] %vm38_vm2, %v3242_v9 }
  0xd2   :  { %2862 = vmatprep.mubr.msk.bf16.mxu0 %vm591_vm0, %v3193_v30  ;;  %2902 = vmatprep.mubr.msk.bf16.mxu1 %vm591_vm0, %v3194_v26  ;;  %73 = vst.msk [vmem:[#allocation2 + $0x110] sm:$0xff] %vm38_vm2, %v3242_v9  ;;  %74 = vst.msk [vmem:[#allocation2 + $0x118] sm:$0xff] %vm38_vm2, %v3242_v9 }
  0xd3   :  { %75 = vst.msk [vmem:[#allocation2 + $0x120] sm:$0xff] %vm38_vm2, %v3242_v9  ;;  %76 = vst.msk [vmem:[#allocation2 + $0x128] sm:$0xff] %vm38_vm2, %v3242_v9 }
  0xd4   :  { %77 = vst.msk [vmem:[#allocation2 + $0x130] sm:$0xff] %vm38_vm2, %v3242_v9  ;;  %78 = vst.msk [vmem:[#allocation2 + $0x138] sm:$0xff] %vm38_vm2, %v3242_v9 }
  0xd5   :  { %79 = vst.msk [vmem:[#allocation2 + $0x140] sm:$0xff] %vm38_vm2, %v3242_v9  ;;  %80 = vst.msk [vmem:[#allocation2 + $0x148] sm:$0xff] %vm38_vm2, %v3242_v9 }
  0xd6   :  { %81 = vst.msk [vmem:[#allocation2 + $0x150] sm:$0xff] %vm38_vm2, %v3242_v9  ;;  %82 = vst.msk [vmem:[#allocation2 + $0x158] sm:$0xff] %vm38_vm2, %v3242_v9 }
  0xd7   :  { %83 = vst.msk [vmem:[#allocation2 + $0x160] sm:$0xff] %vm38_vm2, %v3242_v9  ;;  %84 = vst.msk [vmem:[#allocation2 + $0x168] sm:$0xff] %vm38_vm2, %v3242_v9 }
  0xd8   :  { %85 = vst.msk [vmem:[#allocation2 + $0x170] sm:$0xff] %vm38_vm2, %v3242_v9  ;;  %86 = vst.msk [vmem:[#allocation2 + $0x178] sm:$0xff] %vm38_vm2, %v3242_v9 }
  0xd9   :  { %2863 = vmatmul.mubr.msk.bf16.gmra.mrb[8].mxu0 %vm591_vm0, %v3195_v31  ;;  %2903 = vmatmul.mubr.msk.bf16.gmra.mrb[8].mxu1 %vm591_vm0, %v3196_v27  ;;  %87 = vst.msk [vmem:[#allocation2 + $0x180] sm:$0xff] %vm38_vm2, %v3242_v9  ;;  %88 = vst.msk [vmem:[#allocation2 + $0x188] sm:$0xff] %vm38_vm2, %v3242_v9 }
  0xda   :  { %2866 = vmatprep.mubr.msk.bf16.mxu0 %vm591_vm0, %v3197_v32  ;;  %2906 = vmatprep.mubr.msk.bf16.mxu1 %vm591_vm0, %v3198_v33  ;;  %89 = vst.msk [vmem:[#allocation2 + $0x190] sm:$0xff] %vm38_vm2, %v3242_v9  ;;  %90 = vst.msk [vmem:[#allocation2 + $0x198] sm:$0xff] %vm38_vm2, %v3242_v9 }
  0xdb   :  { %91 = vst.msk [vmem:[#allocation2 + $0x1a0] sm:$0xff] %vm38_vm2, %v3242_v9  ;;  %92 = vst.msk [vmem:[#allocation2 + $0x1a8] sm:$0xff] %vm38_vm2, %v3242_v9 }
  0xdc   :  { %93 = vst.msk [vmem:[#allocation2 + $0x1b0] sm:$0xff] %vm38_vm2, %v3242_v9  ;;  %94 = vst.msk [vmem:[#allocation2 + $0x1b8] sm:$0xff] %vm38_vm2, %v3242_v9 }
  0xdd   :  { %95 = vst.msk [vmem:[#allocation2 + $0x1c0] sm:$0xff] %vm38_vm2, %v3242_v9  ;;  %96 = vst.msk [vmem:[#allocation2 + $0x1c8] sm:$0xff] %vm38_vm2, %v3242_v9 }
  0xde   :  { %97 = vst.msk [vmem:[#allocation2 + $0x1d0] sm:$0xff] %vm38_vm2, %v3242_v9  ;;  %98 = vst.msk [vmem:[#allocation2 + $0x1d8] sm:$0xff] %vm38_vm2, %v3242_v9 }
  0xdf   :  { %99 = vst.msk [vmem:[#allocation2 + $0x1e0] sm:$0xff] %vm38_vm2, %v3242_v9  ;;  %100 = vst.msk [vmem:[#allocation2 + $0x1e8] sm:$0xff] %vm38_vm2, %v3242_v9 }
  0xe0   :  { %101 = vst.msk [vmem:[#allocation2 + $0x1f0] sm:$0xff] %vm38_vm2, %v3242_v9  ;;  %102 = vst.msk [vmem:[#allocation2 + $0x1f8] sm:$0xff] %vm38_vm2, %v3242_v9 }
  0xe1   :  { %2867 = vmatmul.mubr.msk.bf16.gmra.mrb[12].mxu0 %vm591_vm0, %v3199_v34  ;;  %2907 = vmatmul.mubr.msk.bf16.gmra.mrb[12].mxu1 %vm591_vm0, %v3200_v37 }
  0xe2   :  { %2870 = vmatprep.mubr.msk.bf16.mxu0 %vm591_vm0, %v3201_v38  ;;  %2910 = vmatprep.mubr.msk.bf16.mxu1 %vm591_vm0, %v3202_v39 }
  0xe9   :  { %2871 = vmatmul.mubr.msk.bf16.gmra.mrb[16].mxu0 %vm591_vm0, %v3203_v42  ;;  %2911 = vmatmul.mubr.msk.bf16.gmra.mrb[16].mxu1 %vm591_vm0, %v3204_v43 }
  0xea   :  { %2874 = vmatprep.mubr.msk.bf16.mxu0 %vm591_vm0, %v3205_v44  ;;  %2914 = vmatprep.mubr.msk.bf16.mxu1 %vm591_vm0, %v3207_v45 }
  0xf1   :  { %2875 = vmatmul.mubr.msk.bf16.gmra.mrb[20].mxu0 %vm591_vm0, %v3206_v46  ;;  %2915 = vmatmul.mubr.msk.bf16.gmra.mrb[20].mxu1 %vm591_vm0, %v3208_v47 }
  0xf2   :  { %2878 = vmatprep.mubr.msk.bf16.mxu0 %vm591_vm0, %v3209_v49  ;;  %2918 = vmatprep.mubr.msk.bf16.mxu1 %vm591_vm0, %v3211_v48 }
  0xf9   :  { %2879 = vmatmul.mubr.msk.bf16.gmra.mrb[24].mxu0 %vm591_vm0, %v3210_v54  ;;  %2919 = vmatmul.mubr.msk.bf16.gmra.mrb[24].mxu1 %vm591_vm0, %v3212_v51 }
  0xfa   :  { %2882 = vmatprep.mubr.msk.bf16.mxu0 %vm591_vm0, %v3213_v55  ;;  %2922 = vmatprep.mubr.msk.bf16.mxu1 %vm591_vm0, %v3215_v56 }
 0x101   :  { %2883 = vmatmul.mubr.msk.bf16.gmra.mrb[28].mxu0 %vm591_vm0, %v3214_v57  ;;  %2923 = vmatmul.mubr.msk.bf16.gmra.mrb[28].mxu1 %vm591_vm0, %v3216_v60  ;;  %vm2236_vm0 = vcmask 982912  }
 0x19c   :  { %v2856_v50 = vpop.f32.mrb[0].mxu0  ;;  %v2896_v61 = vpop.f32.mrb[0].mxu1 }
 0x19d   :  { %v674_v62 = vpop.f32.mrb[1].mxu0  ;;  %v963_v52 = vpop.f32.mrb[1].mxu1  ;;  %v1097_v63 = vsel %vm1090_vm1, %v2856_v50, -inf  ;;  %v1193_v4 = vsel %vm1090_vm1, %v2896_v61, -inf }
 0x19e   :  { %v3649_v53 = vpop.f32.mrb[2].mxu1  ;;  %1098 = vmax.xlane.f32.xlu1 %v1097_v63  ;;  %v3651_v0 = vpop.f32.mrb[2].mxu0  ;;  %v1187_v1 = vsel %vm1090_vm1, %v963_v52, -inf  ;;  %v3667_v8 = vsel %vm1090_vm1, %v674_v62, -inf }
 0x19f   :  { %1188 = vmax.xlane.f32.xlu0 %v1187_v1  ;;  %v677_v2 = vpop.f32.mrb[3].mxu0  ;;  %v3654_v3 = vpop.f32.mrb[3].mxu1  ;;  %v1100_v14 = vsel %vm1090_vm1, %v3651_v0, -inf  ;;  %v1196_v19 = vsel %vm1090_vm1, %v3649_v53, -inf }
 0x1a0   :  { %v1094_v58 = vsel %vm1090_vm1, %v677_v2, -inf  ;;  %v1190_v31 = vsel %vm1090_vm1, %v3654_v3, -inf }
 0x1a2   :  { %1194 = vmax.xlane.f32.xlu1 %v1193_v4 }
 0x1a3   :  { %1095 = vmax.xlane.f32.xlu0 %v1094_v58 }
 0x1a4   :  { %v3658_v5 = vpop.f32.mrb[4].mxu0  ;;  %v3660_v59 = vpop.f32.mrb[4].mxu1 }
 0x1a5   :  { %v3662_v6 = vpop.f32.mrb[5].mxu0  ;;  %v3664_v7 = vpop.f32.mrb[5].mxu1  ;;  %v1109_v39 = vsel %vm1090_vm1, %v3658_v5, -inf  ;;  %v1205_v55 = vsel %vm1090_vm1, %v3660_v59, -inf }
 0x1a6   :  { %v3797_v10 = vpop.f32.mrb[6].mxu1  ;;  %1092 = vmax.xlane.f32.xlu1 %v3667_v8  ;;  %v3800_v11 = vpop.f32.mrb[6].mxu0  ;;  %v1103_v52 = vsel %vm1090_vm1, %v3662_v6, -inf  ;;  %v1199_v58 = vsel %vm1090_vm1, %v3664_v7, -inf }
 0x1a7   :  { %v3802_v12 = vpop.f32.mrb[7].mxu0  ;;  %v3804_v13 = vpop.f32.mrb[7].mxu1  ;;  %v1112_v6 = vsel %vm1090_vm1, %v3800_v11, -inf }
 0x1aa   :  { %1101 = vmax.xlane.f32.xlu1 %v1100_v14 }
 0x1ac   :  { %v3808_v15 = vpop.f32.mrb[8].mxu0  ;;  %v3810_v16 = vpop.f32.mrb[8].mxu1 }
 0x1ad   :  { %v706_v17 = vpop.f32.mrb[9].mxu0  ;;  %v995_v18 = vpop.f32.mrb[9].mxu1 }
 0x1ae   :  { %v2905_v20 = vpop.f32.mrb[10].mxu1  ;;  %1197 = vmax.xlane.f32.xlu1 %v1196_v19  ;;  %v2865_v21 = vpop.f32.mrb[10].mxu0  ;;  %v3815_v22 = vsel %vm1090_vm1, %v706_v17, -inf  ;;  %v3818_v23 = vsel %vm1090_vm1, %v995_v18, -inf }
 0x1af   :  { %v3821_v24 = vsel %vm1090_vm1, %v2905_v20, -inf  ;;  %v3824_v25 = vsel %vm1090_vm1, %v2865_v21, -inf  ;;  %v709_v28 = vpop.f32.mrb[11].mxu0  ;;  %v998_v29 = vpop.f32.mrb[11].mxu1 }
 0x1b0   :  { %v3827_v30 = vsel %vm1090_vm1, %v709_v28, -inf  ;;  %v3830_v26 = vsel %vm1090_vm1, %v998_v29, -inf }
 0x1b2   :  { %1191 = vmax.xlane.f32.xlu1 %v1190_v31 }
 0x1b4   :  { %v2868_v27 = vpop.f32.mrb[12].mxu0  ;;  %v2908_v32 = vpop.f32.mrb[12].mxu1 }
 0x1b5   :  { %v3835_v33 = vsel %vm1090_vm1, %v2868_v27, -inf  ;;  %v3838_v34 = vsel %vm1090_vm1, %v2908_v32, -inf  ;;  %v722_v37 = vpop.f32.mrb[13].mxu0  ;;  %v1011_v38 = vpop.f32.mrb[13].mxu1 }
 0x1b6   :  { %v3843_v42 = vsel %vm1090_vm1, %v722_v37, -inf  ;;  %v3846_v43 = vsel %vm1090_vm1, %v1011_v38, -inf  ;;  %v2909_v44 = vpop.f32.mrb[14].mxu1  ;;  %1110 = vmax.xlane.f32.xlu1 %v1109_v39  ;;  %v2869_v45 = vpop.f32.mrb[14].mxu0  ;;  %v1208_v37 = vsel %vm1090_vm1, %v3797_v10, -inf }
 0x1b7   :  { %v3849_v46 = vsel %vm1090_vm1, %v2869_v45, -inf  ;;  %v725_v47 = vpop.f32.mrb[15].mxu0  ;;  %v1014_v49 = vpop.f32.mrb[15].mxu1  ;;  %v1232_v48 = vsel %vm1090_vm1, %v2909_v44, -inf  ;;  %v1106_v45 = vsel %vm1090_vm1, %v3802_v12, -inf }
 0x1b8   :  { %v3853_v54 = vsel %vm1090_vm1, %v725_v47, -inf  ;;  %v3856_v51 = vsel %vm1090_vm1, %v1014_v49, -inf  ;;  %1233 = vmax.xlane.f32.xlu0 %v1232_v48 }
 0x1ba   :  { %1206 = vmax.xlane.f32.xlu1 %v1205_v55 }
 0x1bc   :  { %v2872_v56 = vpop.f32.mrb[16].mxu0  ;;  %v2912_v57 = vpop.f32.mrb[16].mxu1 }
 0x1bd   :  { %v3861_v60 = vsel %vm1090_vm1, %v2872_v56, -inf  ;;  %v738_v50 = vpop.f32.mrb[17].mxu0  ;;  %v1027_v61 = vpop.f32.mrb[17].mxu1  ;;  %v1241_v62 = vsel %vm1090_vm1, %v2912_v57, -inf }
 0x1be   :  { %v2913_v63 = vpop.f32.mrb[18].mxu1  ;;  %1242 = vmax.xlane.f32.xlu0 %v1241_v62  ;;  %1104 = vmax.xlane.f32.xlu1 %v1103_v52  ;;  %v2873_v53 = vpop.f32.mrb[18].mxu0  ;;  %v1139_v2 = vsel %vm1090_vm1, %v738_v50, -inf  ;;  %v1235_v8 = vsel %vm1090_vm1, %v1027_v61, -inf }
 0x1bf   :  { %v741_v0 = vpop.f32.mrb[19].mxu0  ;;  %v1030_v1 = vpop.f32.mrb[19].mxu1  ;;  %v1148_v38 = vsel %vm1090_vm1, %v2873_v53, -inf  ;;  %v1244_v47 = vsel %vm1090_vm1, %v2913_v63, -inf }
 0x1c0   :  { %v3868_v3 = vsel %vm1090_vm1, %v741_v0, -inf  ;;  %v3871_v4 = vsel %vm1090_vm1, %v1030_v1, -inf  ;;  %v1202_v1 = vsel %vm1090_vm1, %v3804_v13, -inf }
 0x1c2   :  { %1200 = vmax.xlane.f32.xlu1 %v1199_v58  ;;  %1140 = vmax.xlane.f32.xlu0 %v1139_v2  ;;  %v3934_v2 = vpop.permute.xlu1 %1617 }
 0x1c4   :  { %v2876_v5 = vpop.f32.mrb[20].mxu0  ;;  %v2916_v59 = vpop.f32.mrb[20].mxu1 }
 0x1c5   :  { %v754_v9 = vpop.f32.mrb[21].mxu0  ;;  %v1043_v14 = vpop.f32.mrb[21].mxu1  ;;  %v3879_v17 = vsel %vm1090_vm1, %v2876_v5, -inf  ;;  %v3882_v18 = vsel %vm1090_vm1, %v2916_v59, -inf  ;;  %v1121_v59 = vsel %vm1090_vm1, %v3808_v15, -inf }
 0x1c6   :  { %1113 = vmax.xlane.f32.xlu1 %v1112_v6  ;;  %1236 = vmax.xlane.f32.xlu0 %v1235_v8  ;;  %v2877_v7 = vpop.f32.mrb[22].mxu0  ;;  %v2917_v19 = vpop.f32.mrb[22].mxu1  ;;  %v3885_v20 = vsel %vm1090_vm1, %v754_v9, -inf  ;;  %v3888_v21 = vsel %vm1090_vm1, %v1043_v14, -inf }
 0x1c7   :  { %v757_v11 = vpop.f32.mrb[23].mxu0  ;;  %v1046_v28 = vpop.f32.mrb[23].mxu1  ;;  %v3891_v29 = vsel %vm1090_vm1, %v2877_v7, -inf  ;;  %v3894_v31 = vsel %vm1090_vm1, %v2917_v19, -inf }
 0x1c8   :  { %v3897_v27 = vsel %vm1090_vm1, %v757_v11, -inf  ;;  %v3900_v32 = vsel %vm1090_vm1, %v1046_v28, -inf }
 0x1ca   :  { %1209 = vmax.xlane.f32.xlu1 %v1208_v37  ;;  %1149 = vmax.xlane.f32.xlu0 %v1148_v38 }
 0x1cc   :  { %v2880_v39 = vpop.f32.mrb[24].mxu0  ;;  %v2920_v44 = vpop.f32.mrb[24].mxu1 }
 0x1cd   :  { %v770_v49 = vpop.f32.mrb[25].mxu0  ;;  %v3909_v48 = vsel %vm1090_vm1, %v2920_v44, -inf  ;;  %v1059_v55 = vpop.f32.mrb[25].mxu1  ;;  %v3912_v56 = vsel %vm1090_vm1, %v2880_v39, -inf }
 0x1ce   :  { %1107 = vmax.xlane.f32.xlu1 %v1106_v45  ;;  %1245 = vmax.xlane.f32.xlu0 %v1244_v47  ;;  %v3915_v10 = vsel %vm1090_vm1, %v770_v49, -inf  ;;  %v2881_v57 = vpop.f32.mrb[26].mxu0  ;;  %v3918_v50 = vsel %vm1090_vm1, %v1059_v55, -inf  ;;  %v2921_v12 = vpop.f32.mrb[26].mxu1  ;;  %v1217_v47 = vsel %vm1090_vm1, %v3810_v16, -inf }
 0x1cf   :  { %v3921_v61 = vsel %vm1090_vm1, %v2881_v57, -inf  ;;  %v773_v62 = vpop.f32.mrb[27].mxu0  ;;  %v3924_v52 = vsel %vm1090_vm1, %v2921_v12, -inf  ;;  %v1062_v63 = vpop.f32.mrb[27].mxu1 }
 0x1d0   :  { %v3927_v53 = vsel %vm1090_vm1, %v773_v62, -inf  ;;  %v3930_v0 = vsel %vm1090_vm1, %v1062_v63, -inf  ;;  %v3962_v45 = vpop.permute.xlu1 %1554  ;;  %v3966_v49 = vpop.permute.xlu0 %1621 }
 0x1d2   :  { %1203 = vmax.xlane.f32.xlu1 %v1202_v1 }
 0x1d4   :  { %v2884_v58 = vpop.f32.mrb[28].mxu0  ;;  %v2924_v5 = vpop.f32.mrb[28].mxu1 }
 0x1d5   :  { %v3939_v6 = vsel %vm1090_vm1, %v2884_v58, -inf  ;;  %v786_v8 = vpop.f32.mrb[29].mxu0  ;;  %v3942_v9 = vsel %vm1090_vm1, %v2924_v5, -inf  ;;  %v1075_v14 = vpop.f32.mrb[29].mxu1  ;;  %v1317_v5 = vld [vmem:[#allocation2 + $0x110] sm:$0xff] }
 0x1d6   :  { %1122 = vmax.xlane.f32.xlu1 %v1121_v59  ;;  %v3945_v7 = vsel %vm1090_vm1, %v786_v8, -inf  ;;  %v2885_v13 = vpop.f32.mrb[30].mxu0  ;;  %v3948_v19 = vsel %vm1090_vm1, %v1075_v14, -inf  ;;  %v2925_v11 = vpop.f32.mrb[30].mxu1 }
 0x1d7   :  { %v3951_v28 = vsel %vm1090_vm1, %v2885_v13, -inf  ;;  %v789_v15 = vpop.f32.mrb[31].mxu0  ;;  %v3954_v37 = vsel %vm1090_vm1, %v2925_v11, -inf  ;;  %v1078_v38 = vpop.f32.mrb[31].mxu1  ;;  %v1283_v13 = vld [vmem:[#allocation2] sm:$0xff]  ;;  %v1286_v11 = vld [vmem:[#allocation2 + $0x18] sm:$0xff] }
 0x1d8   :  { %v3957_v39 = vsel %vm1090_vm1, %v789_v15, -inf  ;;  %v3960_v44 = vsel %vm1090_vm1, %v1078_v38, -inf  ;;  %v3969_v55 = vpop.permute.xlu1 %1558  ;;  %v3971_v57 = vpop.permute.xlu0 %1625  ;;  %vm2243_vm1 = vcmask 1048512  }
 0x1da   :  { %1218 = vmax.xlane.f32.xlu1 %v1217_v47 }
 0x1dc   :  { %v3975_v12 = vpop.permute.xlu1 %1562  ;;  %v3977_v62 = vpop.permute.xlu0 %1629 }
 0x1de   :  { %1116 = vmax.xlane.f32.xlu1 %v3815_v22 }
 0x1e0   :  { %v3981_v16 = vpop.permute.xlu1 %1566  ;;  %v3983_v63 = vpop.permute.xlu0 %1633 }
 0x1e2   :  { %1212 = vmax.xlane.f32.xlu1 %v3818_v23 }
 0x1e4   :  { %1677 = vbcast.lane.b32.xlu0 %v3409_v40, 376  ;;  %v3986_v22 = vpop.permute.xlu1 %1570  ;;  %v3988_v1 = vpop.permute.xlu0 %1637 }
 0x1e6   :  { %1125 = vmax.xlane.f32.xlu1 %v3824_v25 }
 0x1e8   :  { %v3992_v40 = vpop.permute.xlu1 %1574  ;;  %v3994_v23 = vpop.permute.xlu0 %1641 }
 0x1ea   :  { %1221 = vmax.xlane.f32.xlu1 %v3821_v24 }
 0x1ec   :  { %v3997_v24 = vpop.permute.xlu1 %1578  ;;  %v3999_v25 = vpop.permute.xlu0 %1645 }
 0x1ee   :  { %1119 = vmax.xlane.f32.xlu1 %v3827_v30 }
 0x1f0   :  { %v4003_v30 = vpop.permute.xlu1 %1582 }
 0x1f2   :  { %1215 = vmax.xlane.f32.xlu1 %v3830_v26  ;;  %v4006_v26 = vpop.permute.xlu0 %1649 }
 0x1f6   :  { %1134 = vmax.xlane.f32.xlu1 %v3835_v33  ;;  %v4010_v33 = vpop.permute.xlu1 %1586 }
 0x1fa   :  { %1230 = vmax.xlane.f32.xlu1 %v3838_v34  ;;  %v4012_v34 = vpop.permute.xlu0 %1653 }
 0x1fe   :  { %1128 = vmax.xlane.f32.xlu1 %v3843_v42  ;;  %v4017_v42 = vpop.permute.xlu1 %1590 }
 0x202   :  { %1224 = vmax.xlane.f32.xlu1 %v3846_v43  ;;  %v4020_v43 = vpop.permute.xlu0 %1657 }
 0x203   :  { %1239 = vmax.xlane.f32.xlu0 %v3871_v4 }
 0x206   :  { %1137 = vmax.xlane.f32.xlu1 %v3849_v46  ;;  %v4024_v46 = vpop.permute.xlu1 %1594  ;;  %v4026_v4 = vpop.permute.xlu0 %1661 }
 0x207   :  { %1158 = vmax.xlane.f32.xlu0 %v3879_v17 }
 0x20a   :  { %1131 = vmax.xlane.f32.xlu1 %v3853_v54  ;;  %v4030_v54 = vpop.permute.xlu1 %1598 }
 0x20b   :  { %1254 = vmax.xlane.f32.xlu0 %v3882_v18 }
 0x20e   :  { %1227 = vmax.xlane.f32.xlu1 %v3856_v51  ;;  %v4033_v51 = vpop.permute.xlu0 %1665  ;;  %v4036_v17 = vpop.permute.xlu1 %1602 }
 0x20f   :  { %1152 = vmax.xlane.f32.xlu0 %v3885_v20  ;;  %v1285_v20 = vld [vmem:[#allocation2 + $0x10] sm:$0xff] }
 0x212   :  { %1146 = vmax.xlane.f32.xlu1 %v3861_v60  ;;  %v4038_v60 = vpop.permute.xlu0 %1669  ;;  %v4041_v18 = vpop.permute.xlu1 %1606 }
 0x213   :  { %1248 = vmax.xlane.f32.xlu0 %v3888_v21  ;;  %v1315_v21 = vld [vmem:[#allocation2 + $0x100] sm:$0xff] }
 0x216   :  { %1143 = vmax.xlane.f32.xlu1 %v3868_v3  ;;  %v4045_v3 = vpop.permute.xlu0 %1673 }
 0x217   :  { %1161 = vmax.xlane.f32.xlu0 %v3891_v29 }
 0x21b   :  { %1257 = vmax.xlane.f32.xlu0 %v3894_v31 }
 0x21f   :  { %1155 = vmax.xlane.f32.xlu0 %v3897_v27 }
 0x223   :  { %1251 = vmax.xlane.f32.xlu0 %v3900_v32  ;;  %v1284_v32 = vld [vmem:[#allocation2 + $0x8] sm:$0xff] }
 0x227   :  { %1170 = vmax.xlane.f32.xlu0 %v3912_v56  ;;  %1610 = vbcast.lane.b32.xlu1 %v3412_v41, 368 }
 0x22b   :  { %v1099_v29 = vpop.xlane.xlu1 %1098  ;;  %1266 = vmax.xlane.f32.xlu0 %v3909_v48  ;;  %1614 = vbcast.lane.b32.xlu1 %v3412_v41, 376 }
 0x22c   :  { %v1349_v31 = vmax.f32 %v1285_v20, %v1099_v29  ;;  %v1189_v27 = vpop.xlane.xlu0 %1188 }
 0x22d   :  { %v1379_v58 = vmax.f32 %v1315_v21, %v1189_v27  ;;  %v1316_v21 = vld [vmem:[#allocation2 + $0x108] sm:$0xff] }
 0x22e   :  { %1414 = vst.msk [vmem:[#allocation2 + $0x10] sm:$0xff] %vm38_vm2, %v1349_v31  ;;  %v1289_v31 = vld [vmem:[#allocation2 + $0x30] sm:$0xff] }
 0x22f   :  { %1444 = vst.msk [vmem:[#allocation2 + $0x100] sm:$0xff] %vm38_vm2, %v1379_v58  ;;  %v1195_v56 = vpop.xlane.xlu1 %1194  ;;  %1164 = vmax.xlane.f32.xlu0 %v3915_v10  ;;  %v1318_v10 = vld [vmem:[#allocation2 + $0x118] sm:$0xff] }
 0x230   :  { %v1381_v59 = vmax.f32 %v1317_v5, %v1195_v56  ;;  %v1096_v8 = vpop.xlane.xlu0 %1095 }
 0x231   :  { %v1348_v14 = vmax.f32 %v1284_v32, %v1096_v8  ;;  %v1321_v32 = vld [vmem:[#allocation2 + $0x130] sm:$0xff]  ;;  %v1287_v8 = vld [vmem:[#allocation2 + $0x20] sm:$0xff] }
 0x232   :  { %1446 = vst.msk [vmem:[#allocation2 + $0x110] sm:$0xff] %vm38_vm2, %v1381_v59  ;;  %v1333_v59 = vld [vmem:[#allocation2 + $0x190] sm:$0xff] }
 0x233   :  { %1413 = vst.msk [vmem:[#allocation2 + $0x8] sm:$0xff] %vm38_vm2, %v1348_v14  ;;  %v1093_v41 = vpop.xlane.xlu1 %1092  ;;  %1260 = vmax.xlane.f32.xlu0 %v3918_v50 }
 0x234   :  { %v1347_v48 = vmax.f32 %v1283_v13, %v1093_v41 }
 0x236   :  { %1412 = vst.msk [vmem:[#allocation2] sm:$0xff] %vm38_vm2, %v1347_v48  ;;  %v1319_v48 = vld [vmem:[#allocation2 + $0x120] sm:$0xff] }
 0x237   :  { %v1102_v15 = vpop.xlane.xlu1 %1101  ;;  %1173 = vmax.xlane.f32.xlu0 %v3921_v61  ;;  %v1330_v61 = vld [vmem:[#allocation2 + $0x178] sm:$0xff] }
 0x238   :  { %v1350_v38 = vmax.f32 %v1286_v11, %v1102_v15  ;;  %v1299_v11 = vld [vmem:[#allocation2 + $0x80] sm:$0xff] }
 0x23a   :  { %1415 = vst.msk [vmem:[#allocation2 + $0x18] sm:$0xff] %vm38_vm2, %v1350_v38 }
 0x23b   :  { %v1198_v47 = vpop.xlane.xlu1 %1197  ;;  %1269 = vmax.xlane.f32.xlu0 %v3924_v52 }
 0x23c   :  { %v1382_v20 = vmax.f32 %v1318_v10, %v1198_v47  ;;  %v1290_v47 = vld [vmem:[#allocation2 + $0x38] sm:$0xff] }
 0x23e   :  { %1447 = vst.msk [vmem:[#allocation2 + $0x118] sm:$0xff] %vm38_vm2, %v1382_v20  ;;  %v1331_v20 = vld [vmem:[#allocation2 + $0x180] sm:$0xff] }
 0x23f   :  { %v1192_v29 = vpop.xlane.xlu1 %1191  ;;  %1167 = vmax.xlane.f32.xlu0 %v3927_v53 }
 0x240   :  { %v1380_v50 = vmax.f32 %v1316_v21, %v1192_v29 }
 0x242   :  { %1445 = vst.msk [vmem:[#allocation2 + $0x108] sm:$0xff] %vm38_vm2, %v1380_v50 }
 0x243   :  { %v1111_v27 = vpop.xlane.xlu1 %1110  ;;  %1263 = vmax.xlane.f32.xlu0 %v3930_v0 }
 0x244   :  { %v1353_v58 = vmax.f32 %v1289_v31, %v1111_v27  ;;  %v1322_v31 = vld [vmem:[#allocation2 + $0x138] sm:$0xff] }
 0x245   :  { %v1234_v5 = vpop.xlane.xlu0 %1233  ;;  %v1302_v27 = vld [vmem:[#allocation2 + $0x98] sm:$0xff] }
 0x246   :  { %1418 = vst.msk [vmem:[#allocation2 + $0x30] sm:$0xff] %vm38_vm2, %v1353_v58  ;;  %v1394_v52 = vmax.f32 %v1330_v61, %v1234_v5 }
 0x247   :  { %v1207_v56 = vpop.xlane.xlu1 %1206  ;;  %1182 = vmax.xlane.f32.xlu0 %v3939_v6 }
 0x248   :  { %1459 = vst.msk [vmem:[#allocation2 + $0x178] sm:$0xff] %vm38_vm2, %v1394_v52  ;;  %v1385_v53 = vmax.f32 %v1321_v32, %v1207_v56  ;;  %v1288_v32 = vld [vmem:[#allocation2 + $0x28] sm:$0xff]  ;;  %v1334_v52 = vld [vmem:[#allocation2 + $0x198] sm:$0xff] }
 0x24a   :  { %1450 = vst.msk [vmem:[#allocation2 + $0x130] sm:$0xff] %vm38_vm2, %v1385_v53 }
 0x24b   :  { %v1243_v14 = vpop.xlane.xlu0 %1242  ;;  %v1105_v13 = vpop.xlane.xlu1 %1104  ;;  %1278 = vmax.xlane.f32.xlu0 %v3942_v9 }
 0x24c   :  { %v1397_v0 = vmax.f32 %v1333_v59, %v1243_v14  ;;  %v1351_v41 = vmax.f32 %v1287_v8, %v1105_v13  ;;  %v1320_v8 = vld [vmem:[#allocation2 + $0x128] sm:$0xff]  ;;  %v1293_v13 = vld [vmem:[#allocation2 + $0x50] sm:$0xff] }
 0x24e   :  { %1462 = vst.msk [vmem:[#allocation2 + $0x190] sm:$0xff] %vm38_vm2, %v1397_v0  ;;  %1416 = vst.msk [vmem:[#allocation2 + $0x20] sm:$0xff] %vm38_vm2, %v1351_v41 }
 0x24f   :  { %v1201_v6 = vpop.xlane.xlu1 %1200  ;;  %v1141_v15 = vpop.xlane.xlu0 %1140  ;;  %1176 = vmax.xlane.f32.xlu0 %v3945_v7 }
 0x250   :  { %v1383_v38 = vmax.f32 %v1319_v48, %v1201_v6  ;;  %v1363_v10 = vmax.f32 %v1299_v11, %v1141_v15  ;;  %v1325_v48 = vld [vmem:[#allocation2 + $0x150] sm:$0xff]  ;;  %v1291_v6 = vld [vmem:[#allocation2 + $0x40] sm:$0xff] }
 0x252   :  { %1448 = vst.msk [vmem:[#allocation2 + $0x120] sm:$0xff] %vm38_vm2, %v1383_v38  ;;  %1428 = vst.msk [vmem:[#allocation2 + $0x80] sm:$0xff] %vm38_vm2, %v1363_v10  ;;  %v1479_v10 = vld [vmem:[#allocation2] sm:$0xff] }
 0x253   :  { %v1114_v9 = vpop.xlane.xlu1 %1113  ;;  %v1237_v21 = vpop.xlane.xlu0 %1236  ;;  %1272 = vmax.xlane.f32.xlu0 %v3948_v19 }
 0x254   :  { %v1354_v29 = vmax.f32 %v1290_v47, %v1114_v9  ;;  %v1395_v50 = vmax.f32 %v1331_v20, %v1237_v21  ;;  %v1480_v47 = vld [vmem:[#allocation2 + $0x8] sm:$0xff]  ;;  %v1711_v9 = vadd.f32 %v3962_v45, %v1479_v10 }
 0x255   :  { %v1529_v21 = vld [vmem:[#allocation2 + $0x190] sm:$0xff] }
 0x256   :  { %1419 = vst.msk [vmem:[#allocation2 + $0x38] sm:$0xff] %vm38_vm2, %v1354_v29  ;;  %1460 = vst.msk [vmem:[#allocation2 + $0x180] sm:$0xff] %vm38_vm2, %v1395_v50  ;;  %v1294_v29 = vld [vmem:[#allocation2 + $0x58] sm:$0xff]  ;;  %v1712_v50 = vadd.f32 %v3969_v55, %v1480_v47  ;;  %v1297_v47 = vld [vmem:[#allocation2 + $0x70] sm:$0xff] }
 0x257   :  { %v1210_v7 = vpop.xlane.xlu1 %1209  ;;  %v1150_v61 = vpop.xlane.xlu0 %1149  ;;  %1185 = vmax.xlane.f32.xlu0 %v3951_v28 }
 0x258   :  { %v1386_v58 = vmax.f32 %v1322_v31, %v1210_v7  ;;  %v1366_v5 = vmax.f32 %v1302_v27, %v1150_v61  ;;  %v1512_v31 = vld [vmem:[#allocation2 + $0x108] sm:$0xff]  ;;  %v1775_v7 = vmax.f32 %v1711_v9, 0.0  ;;  %v1761_v61 = vadd.f32 %v3971_v57, %v1529_v21 }
 0x25a   :  { %1451 = vst.msk [vmem:[#allocation2 + $0x138] sm:$0xff] %vm38_vm2, %v1386_v58  ;;  %1431 = vst.msk [vmem:[#allocation2 + $0x98] sm:$0xff] %vm38_vm2, %v1366_v5 }
 0x25b   :  { %v1108_v19 = vpop.xlane.xlu1 %1107  ;;  %v1246_v56 = vpop.xlane.xlu0 %1245  ;;  %1281 = vmax.xlane.f32.xlu0 %v3954_v37 }
 0x25c   :  { %v1352_v53 = vmax.f32 %v1288_v32, %v1108_v19  ;;  %v1398_v59 = vmax.f32 %v1334_v52, %v1246_v56  ;;  %v1326_v32 = vld [vmem:[#allocation2 + $0x158] sm:$0xff]  ;;  %v1776_v52 = vmax.f32 %v1712_v50, 0.0  ;;  %v1744_v19 = vadd.f32 %v3969_v55, %v1512_v31  ;;  %v1513_v56 = vld [vmem:[#allocation2 + $0x110] sm:$0xff]  ;;  %v1295_v50 = vld [vmem:[#allocation2 + $0x60] sm:$0xff] }
 0x25e   :  { %1417 = vst.msk [vmem:[#allocation2 + $0x28] sm:$0xff] %vm38_vm2, %v1352_v53  ;;  %1463 = vst.msk [vmem:[#allocation2 + $0x198] sm:$0xff] %vm38_vm2, %v1398_v59  ;;  %v3025_v59 = vpack.i.bf16 %v1776_v52, %v1775_v7 }
 0x25f   :  { %v1204_v28 = vpop.xlane.xlu1 %1203  ;;  %1179 = vmax.xlane.f32.xlu0 %v3957_v39  ;;  %v1323_v39 = vld [vmem:[#allocation2 + $0x140] sm:$0xff] }
 0x260   :  { %v1384_v14 = vmax.f32 %v1320_v8, %v1204_v28  ;;  %v1825_v8 = vmax.f32 %v1761_v61, 0.0  ;;  %v1327_v61 = vld [vmem:[#allocation2 + $0x160] sm:$0xff] }
 0x262   :  { %1449 = vst.msk [vmem:[#allocation2 + $0x128] sm:$0xff] %vm38_vm2, %v1384_v14 }
 0x263   :  { %v1123_v0 = vpop.xlane.xlu1 %1122  ;;  %1275 = vmax.xlane.f32.xlu0 %v3960_v44 }
 0x264   :  { %v1357_v41 = vmax.f32 %v1293_v13, %v1123_v0  ;;  %v1292_v13 = vld [vmem:[#allocation2 + $0x48] sm:$0xff]  ;;  %v1808_v0 = vmax.f32 %v1744_v19, 0.0 }
 0x265   :  { %v1530_v5 = vld [vmem:[#allocation2 + $0x198] sm:$0xff] }
 0x266   :  { %1422 = vst.msk [vmem:[#allocation2 + $0x50] sm:$0xff] %vm38_vm2, %v1357_v41  ;;  %v1762_v28 = vadd.f32 %v3977_v62, %v1530_v5  ;;  %v1745_v41 = vadd.f32 %v3975_v12, %v1513_v56  ;;  %v1298_v56 = vld [vmem:[#allocation2 + $0x78] sm:$0xff] }
 0x267   :  { %v1219_v37 = vpop.xlane.xlu1 %1218 }
 0x268   :  { %v1389_v11 = vmax.f32 %v1325_v48, %v1219_v37  ;;  %v3035_v37 = vpack.i.bf16 %v1825_v8, %v1808_v0  ;;  %v1337_v0 = vld [vmem:[#allocation2 + $0x1b0] sm:$0xff] }
 0x26a   :  { %1454 = vst.msk [vmem:[#allocation2 + $0x150] sm:$0xff] %vm38_vm2, %v1389_v11  ;;  %v1826_v11 = vmax.f32 %v1762_v28, 0.0 }
 0x26b   :  { %v1117_v15 = vpop.xlane.xlu1 %1116 }
 0x26c   :  { %v1355_v38 = vmax.f32 %v1291_v6, %v1117_v15  ;;  %v1324_v6 = vld [vmem:[#allocation2 + $0x148] sm:$0xff]  ;;  %v1809_v15 = vmax.f32 %v1745_v41, 0.0 }
 0x26e   :  { %1420 = vst.msk [vmem:[#allocation2 + $0x40] sm:$0xff] %vm38_vm2, %v1355_v38  ;;  %v3045_v10 = vpack.i.bf16 %v1826_v11, %v1809_v15 }
 0x26f   :  { %v1213_v20 = vpop.xlane.xlu1 %1212 }
 0x270   :  { %v1387_v44 = vmax.f32 %v1323_v39, %v1213_v20 }
 0x272   :  { %1452 = vst.msk [vmem:[#allocation2 + $0x140] sm:$0xff] %vm38_vm2, %v1387_v44  ;;  %v1329_v44 = vld [vmem:[#allocation2 + $0x170] sm:$0xff] }
 0x273   :  { %v1126_v27 = vpop.xlane.xlu1 %1125 }
 0x274   :  { %v1358_v58 = vmax.f32 %v1294_v29, %v1126_v27  ;;  %v4101_v27 = vpop.permute.xlu0 %1677 }
 0x276   :  { %1423 = vst.msk [vmem:[#allocation2 + $0x58] sm:$0xff] %vm38_vm2, %v1358_v58  ;;  %v1332_v58 = vld [vmem:[#allocation2 + $0x188] sm:$0xff] }
 0x277   :  { %v1222_v53 = vpop.xlane.xlu1 %1221 }
 0x278   :  { %v1390_v14 = vmax.f32 %v1326_v32, %v1222_v53  ;;  %v1305_v53 = vld [vmem:[#allocation2 + $0xb0] sm:$0xff] }
 0x279   :  { %3026 = vperm.xlu0 %3023, %v3025_v59  }
 0x27a   :  { %1455 = vst.msk [vmem:[#allocation2 + $0x158] sm:$0xff] %vm38_vm2, %v1390_v14 }
 0x27b   :  { %v1120_v48 = vpop.xlane.xlu1 %1119 }
 0x27c   :  { %v1356_v55 = vmax.f32 %v1292_v13, %v1120_v48  ;;  %v1296_v13 = vld [vmem:[#allocation2 + $0x68] sm:$0xff] }
 0x27d   :  { %3036 = vperm.xlu0 %3023, %v3035_v37  }
 0x27e   :  { %1421 = vst.msk [vmem:[#allocation2 + $0x48] sm:$0xff] %vm38_vm2, %v1356_v55  ;;  %v1328_v55 = vld [vmem:[#allocation2 + $0x168] sm:$0xff] }
 0x27f   :  { %v1216_v38 = vpop.xlane.xlu1 %1215 }
 0x280   :  { %v1388_v39 = vmax.f32 %v1324_v6, %v1216_v38  ;;  %v1303_v6 = vld [vmem:[#allocation2 + $0xa0] sm:$0xff] }
 0x281   :  { %3046 = vperm.xlu0 %3023, %v3045_v10  }
 0x282   :  { %1453 = vst.msk [vmem:[#allocation2 + $0x148] sm:$0xff] %vm38_vm2, %v1388_v39 }
 0x283   :  { %v1135_v20 = vpop.xlane.xlu1 %1134 }
 0x284   :  { %v1361_v9 = vmax.f32 %v1297_v47, %v1135_v20  ;;  %v1301_v47 = vld [vmem:[#allocation2 + $0x90] sm:$0xff]  ;;  %v1335_v20 = vld [vmem:[#allocation2 + $0x1a0] sm:$0xff] }
 0x286   :  { %1426 = vst.msk [vmem:[#allocation2 + $0x70] sm:$0xff] %vm38_vm2, %v1361_v9 }
 0x287   :  { %v1231_v21 = vpop.xlane.xlu1 %1230 }
 0x288   :  { %v1393_v29 = vmax.f32 %v1329_v44, %v1231_v21 }
 0x28a   :  { %1458 = vst.msk [vmem:[#allocation2 + $0x170] sm:$0xff] %vm38_vm2, %v1393_v29 }
 0x28b   :  { %v1129_v31 = vpop.xlane.xlu1 %1128 }
 0x28c   :  { %v1359_v7 = vmax.f32 %v1295_v50, %v1129_v31  ;;  %v1300_v50 = vld [vmem:[#allocation2 + $0x88] sm:$0xff]  ;;  %v1306_v31 = vld [vmem:[#allocation2 + $0xb8] sm:$0xff] }
 0x28e   :  { %1424 = vst.msk [vmem:[#allocation2 + $0x60] sm:$0xff] %vm38_vm2, %v1359_v7 }
 0x28f   :  { %v1225_v5 = vpop.xlane.xlu1 %1224 }
 0x290   :  { %v1391_v32 = vmax.f32 %v1327_v61, %v1225_v5  ;;  %v1240_v52 = vpop.xlane.xlu0 %1239 }
 0x291   :  { %v1396_v19 = vmax.f32 %v1332_v58, %v1240_v52  ;;  %v1338_v52 = vld [vmem:[#allocation2 + $0x1b8] sm:$0xff] }
 0x292   :  { %1456 = vst.msk [vmem:[#allocation2 + $0x160] sm:$0xff] %vm38_vm2, %v1391_v32  ;;  %v1511_v32 = vld [vmem:[#allocation2 + $0x100] sm:$0xff] }
 0x293   :  { %1461 = vst.msk [vmem:[#allocation2 + $0x188] sm:$0xff] %vm38_vm2, %v1396_v19  ;;  %v1138_v59 = vpop.xlane.xlu1 %1137  ;;  %v1498_v19 = vld [vmem:[#allocation2 + $0x98] sm:$0xff] }
 0x294   :  { %v1362_v8 = vmax.f32 %v1298_v56, %v1138_v59  ;;  %v1159_v28 = vpop.xlane.xlu0 %1158  ;;  %v1481_v59 = vld [vmem:[#allocation2 + $0x10] sm:$0xff] }
 0x295   :  { %v1369_v14 = vmax.f32 %v1305_v53, %v1159_v28  ;;  %v1743_v53 = vadd.f32 %v3962_v45, %v1511_v32 }
 0x296   :  { %1427 = vst.msk [vmem:[#allocation2 + $0x78] sm:$0xff] %vm38_vm2, %v1362_v8 }
 0x297   :  { %1434 = vst.msk [vmem:[#allocation2 + $0xb0] sm:$0xff] %vm38_vm2, %v1369_v14  ;;  %v1132_v41 = vpop.xlane.xlu1 %1131  ;;  %v1730_v14 = vadd.f32 %v3977_v62, %v1498_v19 }
 0x298   :  { %v1360_v48 = vmax.f32 %v1296_v13, %v1132_v41  ;;  %v1255_v37 = vpop.xlane.xlu0 %1254  ;;  %v1495_v13 = vld [vmem:[#allocation2 + $0x80] sm:$0xff] }
 0x299   :  { %v1401_v11 = vmax.f32 %v1337_v0, %v1255_v37  ;;  %v1304_v0 = vld [vmem:[#allocation2 + $0xa8] sm:$0xff]  ;;  %v1713_v37 = vadd.f32 %v3975_v12, %v1481_v59  ;;  %v1727_v45 = vadd.f32 %v3934_v2, %v1495_v13 }
 0x29a   :  { %1425 = vst.msk [vmem:[#allocation2 + $0x68] sm:$0xff] %vm38_vm2, %v1360_v48  ;;  %v1528_v48 = vld [vmem:[#allocation2 + $0x188] sm:$0xff] }
 0x29b   :  { %1466 = vst.msk [vmem:[#allocation2 + $0x1b0] sm:$0xff] %vm38_vm2, %v1401_v11  ;;  %v1228_v15 = vpop.xlane.xlu1 %1227  ;;  %v1760_v62 = vadd.f32 %v3966_v49, %v1528_v48  ;;  %v1777_v12 = vmax.f32 %v1713_v37, 0.0 }
 0x29c   :  { %v1392_v38 = vmax.f32 %v1328_v55, %v1228_v15  ;;  %v1153_v10 = vpop.xlane.xlu0 %1152  ;;  %v1807_v15 = vmax.f32 %v1743_v53, 0.0  ;;  %v1309_v53 = vld [vmem:[#allocation2 + $0xd0] sm:$0xff] }
 0x29d   :  { %v1367_v39 = vmax.f32 %v1303_v6, %v1153_v10  ;;  %v1824_v19 = vmax.f32 %v1760_v62, 0.0 }
 0x29e   :  { %1457 = vst.msk [vmem:[#allocation2 + $0x168] sm:$0xff] %vm38_vm2, %v1392_v38  ;;  %v1527_v38 = vld [vmem:[#allocation2 + $0x180] sm:$0xff] }
 0x29f   :  { %1432 = vst.msk [vmem:[#allocation2 + $0xa0] sm:$0xff] %vm38_vm2, %v1367_v39  ;;  %v1147_v9 = vpop.xlane.xlu1 %1146  ;;  %v1794_v39 = vmax.f32 %v1730_v14, 0.0 }
 0x2a0   :  { %v1365_v44 = vmax.f32 %v1301_v47, %v1147_v9  ;;  %v1249_v21 = vpop.xlane.xlu0 %1248  ;;  %v1336_v9 = vld [vmem:[#allocation2 + $0x1a8] sm:$0xff] }
 0x2a1   :  { %v1399_v29 = vmax.f32 %v1335_v20, %v1249_v21  ;;  %v1516_v20 = vld [vmem:[#allocation2 + $0x128] sm:$0xff] }
 0x2a2   :  { %1430 = vst.msk [vmem:[#allocation2 + $0x90] sm:$0xff] %vm38_vm2, %v1365_v44  ;;  %v1533_v11 = vld [vmem:[#allocation2 + $0x1b0] sm:$0xff] }
 0x2a3   :  { %1464 = vst.msk [vmem:[#allocation2 + $0x1a0] sm:$0xff] %vm38_vm2, %v1399_v29  ;;  %v1144_v7 = vpop.xlane.xlu1 %1143  ;;  %v1765_v21 = vadd.f32 %v3994_v23, %v1533_v11  ;;  %v1759_v29 = vadd.f32 %v3934_v2, %v1527_v38  ;;  %v1341_v38 = vld [vmem:[#allocation2 + $0x1d0] sm:$0xff] }
 0x2a4   :  { %v1364_v61 = vmax.f32 %v1300_v50, %v1144_v7  ;;  %v1162_v58 = vpop.xlane.xlu0 %1161  ;;  %v1501_v50 = vld [vmem:[#allocation2 + $0xb0] sm:$0xff] }
 0x2a5   :  { %v1370_v5 = vmax.f32 %v1306_v31, %v1162_v58  ;;  %v1823_v13 = vmax.f32 %v1759_v29, 0.0  ;;  %v1485_v29 = vld [vmem:[#allocation2 + $0x30] sm:$0xff] }
 0x2a6   :  { %1429 = vst.msk [vmem:[#allocation2 + $0x88] sm:$0xff] %vm38_vm2, %v1364_v61  ;;  %v1791_v61 = vmax.f32 %v1727_v45, 0.0  ;;  %v1499_v14 = vld [vmem:[#allocation2 + $0xa0] sm:$0xff]  ;;  %v1517_v45 = vld [vmem:[#allocation2 + $0x130] sm:$0xff] }
 0x2a7   :  { %1435 = vst.msk [vmem:[#allocation2 + $0xb8] sm:$0xff] %vm38_vm2, %v1370_v5  ;;  %v1748_v5 = vadd.f32 %v3992_v40, %v1516_v20 }
 0x2a8   :  { %v1258_v56 = vpop.xlane.xlu0 %1257 }
 0x2a9   :  { %v1402_v8 = vmax.f32 %v1338_v52, %v1258_v56  ;;  %v1497_v28 = vld [vmem:[#allocation2 + $0x90] sm:$0xff]  ;;  %v3040_v52 = vpack.i.bf16 %v1794_v39, %v1777_v12  ;;  %v1484_v56 = vld [vmem:[#allocation2 + $0x28] sm:$0xff]  ;;  %v1812_v48 = vmax.f32 %v1748_v5, 0.0 }
 0x2aa   :  { %v1729_v41 = vadd.f32 %v3971_v57, %v1497_v28  ;;  %v1531_v31 = vld [vmem:[#allocation2 + $0x1a0] sm:$0xff]  ;;  %v1733_v28 = vadd.f32 %v3994_v23, %v1501_v50  ;;  %v1716_v37 = vadd.f32 %v3992_v40, %v1484_v56  ;;  %v1731_v23 = vadd.f32 %v3983_v63, %v1499_v14 }
 0x2ab   :  { %1467 = vst.msk [vmem:[#allocation2 + $0x1b8] sm:$0xff] %vm38_vm2, %v1402_v8  ;;  %v1829_v8 = vmax.f32 %v1765_v21, 0.0  ;;  %v1763_v2 = vadd.f32 %v3983_v63, %v1531_v31  ;;  %v1749_v21 = vadd.f32 %v3997_v24, %v1517_v45  ;;  %v1515_v50 = vld [vmem:[#allocation2 + $0x120] sm:$0xff]  ;;  %v1488_v45 = vld [vmem:[#allocation2 + $0x48] sm:$0xff] }
 0x2ac   :  { %v1156_v55 = vpop.xlane.xlu0 %1155  ;;  %v1793_v6 = vmax.f32 %v1729_v41, 0.0  ;;  %v1797_v39 = vmax.f32 %v1733_v28, 0.0  ;;  %v1795_v12 = vmax.f32 %v1731_v23, 0.0  ;;  %v1307_v31 = vld [vmem:[#allocation2 + $0xc0] sm:$0xff] }
 0x2ad   :  { %v1368_v10 = vmax.f32 %v1304_v0, %v1156_v55  ;;  %v1496_v47 = vld [vmem:[#allocation2 + $0x88] sm:$0xff]  ;;  %v1482_v55 = vld [vmem:[#allocation2 + $0x18] sm:$0xff]  ;;  %v1339_v14 = vld [vmem:[#allocation2 + $0x1c0] sm:$0xff] }
 0x2ae   :  { %v3030_v57 = vpack.i.bf16 %v1807_v15, %v1793_v6  ;;  %v1728_v44 = vadd.f32 %v3966_v49, %v1496_v47  ;;  %v1514_v49 = vld [vmem:[#allocation2 + $0x118] sm:$0xff]  ;;  %v3055_v15 = vpack.i.bf16 %v1824_v19, %v1823_v13  ;;  %v1827_v47 = vmax.f32 %v1763_v2, 0.0  ;;  %v1483_v2 = vld [vmem:[#allocation2 + $0x20] sm:$0xff] }
 0x2af   :  { %1433 = vst.msk [vmem:[#allocation2 + $0xa8] sm:$0xff] %vm38_vm2, %v1368_v10  ;;  %v1746_v11 = vadd.f32 %v3981_v16, %v1514_v49  ;;  %v3065_v10 = vpack.i.bf16 %v1829_v8, %v1812_v48  ;;  %v1714_v20 = vadd.f32 %v3981_v16, %v1482_v55  ;;  %v1813_v49 = vmax.f32 %v1749_v21, 0.0  ;;  %v1520_v48 = vld [vmem:[#allocation2 + $0x148] sm:$0xff] }
 0x2b0   :  { %v1252_v7 = vpop.xlane.xlu0 %1251  ;;  %3031 = vperm.xlu1 %3024, %v3030_v57   ;;  %v1792_v58 = vmax.f32 %v1728_v44, 0.0  ;;  %v1780_v57 = vmax.f32 %v1716_v37, 0.0  ;;  %v1752_v23 = vadd.f32 %v4017_v42, %v1520_v48  ;;  %v1856_v48 = vld [vmem:[%s4597_s5 + $0x88] sm:$0xff] }
 0x2b1   :  { %v1400_v32 = vmax.f32 %v1336_v9, %v1252_v7  ;;  %v1502_v9 = vld [vmem:[#allocation2 + $0xb8] sm:$0xff]  ;;  %v1810_v44 = vmax.f32 %v1746_v11, 0.0  ;;  %v1778_v16 = vmax.f32 %v1714_v20, 0.0 }
 0x2b2   :  { %v3050_v59 = vpack.i.bf16 %v1792_v58, %v1791_v61  ;;  %v1534_v0 = vld [vmem:[#allocation2 + $0x1b8] sm:$0xff]  ;;  %v3060_v7 = vpack.i.bf16 %v1797_v39, %v1780_v57  ;;  %v1734_v5 = vadd.f32 %v3999_v25, %v1502_v9 }
 0x2b3   :  { %1465 = vst.msk [vmem:[#allocation2 + $0x1a8] sm:$0xff] %vm38_vm2, %v1400_v32  ;;  %v1766_v62 = vadd.f32 %v3999_v25, %v1534_v0  ;;  %v3075_v61 = vpack.i.bf16 %v1827_v47, %v1810_v44  ;;  %v3070_v28 = vpack.i.bf16 %v1795_v12, %v1778_v16  ;;  %v1816_v44 = vmax.f32 %v1752_v23, 0.0  ;;  %v1342_v12 = vld [vmem:[#allocation2 + $0x1d8] sm:$0xff] }
 0x2b4   :  { %v1171_v41 = vpop.xlane.xlu0 %1170  ;;  %3041 = vperm.xlu1 %3024, %v3040_v52   ;;  %3051 = vperm.xlu0 %3023, %v3050_v59   ;;  %v1747_v59 = vadd.f32 %v3986_v22, %v1515_v50  ;;  %v1798_v13 = vmax.f32 %v1734_v5, 0.0 }
 0x2b5   :  { %v1373_v6 = vmax.f32 %v1309_v53, %v1171_v41  ;;  %v1830_v58 = vmax.f32 %v1766_v62, 0.0  ;;  %v1717_v53 = vadd.f32 %v3997_v24, %v1485_v29 }
 0x2b6   :  { %v1500_v19 = vld [vmem:[#allocation2 + $0xa8] sm:$0xff]  ;;  %v1811_v24 = vmax.f32 %v1747_v59, 0.0 }
 0x2b7   :  { %1438 = vst.msk [vmem:[#allocation2 + $0xd0] sm:$0xff] %vm38_vm2, %v1373_v6  ;;  %v3085_v25 = vpack.i.bf16 %v1830_v58, %v1813_v49  ;;  %v1732_v41 = vadd.f32 %v3988_v1, %v1500_v19  ;;  %v1781_v55 = vmax.f32 %v1717_v53, 0.0  ;;  %v1715_v6 = vadd.f32 %v3986_v22, %v1483_v2  ;;  %v1489_v53 = vld [vmem:[#allocation2 + $0x50] sm:$0xff] }
 0x2b8   :  { %v1267_v40 = vpop.xlane.xlu0 %1266  ;;  %3056 = vperm.xlu1 %3024, %v3055_v15   ;;  %3066 = vperm.xlu0 %3023, %v3065_v10   ;;  %v1720_v22 = vadd.f32 %v4017_v42, %v1488_v45 }
 0x2b9   :  { %v1405_v63 = vmax.f32 %v1341_v38, %v1267_v40  ;;  %v1310_v38 = vld [vmem:[#allocation2 + $0xd8] sm:$0xff]  ;;  %v3080_v10 = vpack.i.bf16 %v1798_v13, %v1781_v55  ;;  %v1796_v47 = vmax.f32 %v1732_v41, 0.0  ;;  %v1779_v40 = vmax.f32 %v1715_v6, 0.0  ;;  %v1521_v41 = vld [vmem:[#allocation2 + $0x150] sm:$0xff] }
 0x2ba   :  { %v1532_v32 = vld [vmem:[#allocation2 + $0x1a8] sm:$0xff]  ;;  %v1784_v5 = vmax.f32 %v1720_v22, 0.0  ;;  %v1839_v55 = vld [vmem:[%s4597_s5] sm:$0xff] }
 0x2bb   :  { %1470 = vst.msk [vmem:[#allocation2 + $0x1d0] sm:$0xff] %vm38_vm2, %v1405_v63  ;;  %v1764_v52 = vadd.f32 %v3988_v1, %v1532_v32  ;;  %v1486_v63 = vld [vmem:[#allocation2 + $0x38] sm:$0xff]  ;;  %v3090_v29 = vpack.i.bf16 %v1796_v47, %v1779_v40  ;;  %v1753_v47 = vadd.f32 %v4024_v46, %v1521_v41 }
 0x2bc   :  { %v1165_v56 = vpop.xlane.xlu0 %1164  ;;  %3061 = vperm.xlu1 %3024, %v3060_v7   ;;  %3076 = vperm.xlu0 %3023, %v3075_v61   ;;  %v1518_v7 = vld [vmem:[#allocation2 + $0x138] sm:$0xff]  ;;  %v1718_v32 = vadd.f32 %v4003_v30, %v1486_v63 }
 0x2bd   :  { %v1371_v8 = vmax.f32 %v1307_v31, %v1165_v56  ;;  %v1828_v0 = vmax.f32 %v1764_v52, 0.0  ;;  %v1750_v16 = vadd.f32 %v4003_v30, %v1518_v7  ;;  %v1308_v52 = vld [vmem:[#allocation2 + $0xc8] sm:$0xff]  ;;  %v1855_v30 = vld [vmem:[%s4597_s5 + $0x80] sm:$0xff] }
 0x2be   :  { %v1505_v37 = vld [vmem:[#allocation2 + $0xd0] sm:$0xff]  ;;  %v1782_v2 = vmax.f32 %v1718_v32, 0.0 }
 0x2bf   :  { %1436 = vst.msk [vmem:[#allocation2 + $0xc0] sm:$0xff] %vm38_vm2, %v1371_v8  ;;  %v3095_v39 = vpack.i.bf16 %v1828_v0, %v1811_v24  ;;  %v1737_v62 = vadd.f32 %v4020_v43, %v1505_v37  ;;  %v1721_v0 = vadd.f32 %v4024_v46, %v1489_v53  ;;  %v1840_v24 = vld [vmem:[%s4597_s5 + $0x8] sm:$0xff]  ;;  %v1857_v46 = vld [vmem:[%s4597_s5 + $0x90] sm:$0xff] }
 0x2c0   :  { %v1261_v11 = vpop.xlane.xlu0 %1260  ;;  %3071 = vperm.xlu1 %3024, %v3070_v28   ;;  %3086 = vperm.xlu0 %3023, %v3085_v25   ;;  %v1340_v28 = vld [vmem:[#allocation2 + $0x1c8] sm:$0xff]  ;;  %v1814_v25 = vmax.f32 %v1750_v16, 0.0  ;;  %v2963_v23 = vpack.c.bf16 %v1840_v24, %v1839_v55 }
 0x2c1   :  { %v1403_v15 = vmax.f32 %v1339_v14, %v1261_v11  ;;  %v1801_v50 = vmax.f32 %v1737_v62, 0.0  ;;  %v2961_v11 = vpack.c.bf16 %v1856_v48, %v1855_v30  ;;  %v1492_v53 = vld [vmem:[#allocation2 + $0x68] sm:$0xff] }
 0x2c2   :  { %v1537_v1 = vld [vmem:[#allocation2 + $0x1d0] sm:$0xff]  ;;  %v1724_v30 = vadd.f32 %v4041_v18, %v1492_v53 }
 0x2c3   :  { %1468 = vst.msk [vmem:[#allocation2 + $0x1c0] sm:$0xff] %vm38_vm2, %v1403_v15  ;;  %v1769_v20 = vadd.f32 %v4020_v43, %v1537_v1  ;;  %v3100_v19 = vpack.i.bf16 %v1801_v50, %v1784_v5  ;;  %2962 = vmatprep.subr.bf16.mxu0 %v2961_v11  ;;  %v1313_v1 = vld [vmem:[#allocation2 + $0xf0] sm:$0xff]  ;;  %v1524_v11 = vld [vmem:[#allocation2 + $0x168] sm:$0xff] }
 0x2c4   :  { %v1174_v9 = vpop.xlane.xlu0 %1173  ;;  %3081 = vperm.xlu1 %3024, %v3080_v10   ;;  %3096 = vperm.xlu0 %3023, %v3095_v39   ;;  %v1785_v10 = vmax.f32 %v1721_v0, 0.0  ;;  %v1345_v50 = vld [vmem:[#allocation2 + $0x1f0] sm:$0xff]  ;;  %v1844_v0 = vld [vmem:[%s4597_s5 + $0x28] sm:$0xff] }
 0x2c5   :  { %v1374_v57 = vmax.f32 %v1310_v38, %v1174_v9  ;;  %v1833_v21 = vmax.f32 %v1769_v20, 0.0  ;;  %2964 = vmatpush3.bf16.msra.mxu0 %v2963_v23  ;;  %v1487_v20 = vld [vmem:[#allocation2 + $0x40] sm:$0xff]  ;;  %v1788_v23 = vmax.f32 %v1724_v30, 0.0  ;;  %v1493_v53 = vld [vmem:[#allocation2 + $0x70] sm:$0xff] }
 0x2c6   :  { %v1503_v31 = vld [vmem:[#allocation2 + $0xc0] sm:$0xff] }
 0x2c7   :  { %1439 = vst.msk [vmem:[#allocation2 + $0xd8] sm:$0xff] %vm38_vm2, %v1374_v57  ;;  %v3105_v61 = vpack.i.bf16 %v1833_v21, %v1816_v44  ;;  %v1735_v43 = vadd.f32 %v4006_v26, %v1503_v31  ;;  %v1519_v57 = vld [vmem:[#allocation2 + $0x140] sm:$0xff]  ;;  %v1817_v21 = vmax.f32 %v1753_v47, 0.0  ;;  %v1490_v47 = vld [vmem:[#allocation2 + $0x58] sm:$0xff] }
 0x2c8   :  { %v1270_v58 = vpop.xlane.xlu0 %1269  ;;  %3091 = vperm.xlu1 %3024, %v3090_v29   ;;  %v1858_v29 = vld [vmem:[%s4597_s5 + $0x98] sm:$0xff] }
 0x2c9   :  { %v1406_v42 = vmax.f32 %v1342_v12, %v1270_v58  ;;  %3106 = vperm.xlu0 %3023, %v3105_v61   ;;  %v1799_v56 = vmax.f32 %v1735_v43, 0.0  ;;  %v1719_v12 = vadd.f32 %v4010_v33, %v1487_v20  ;;  %v2965_v7 = vpack.c.bf16 %v1858_v29, %v1857_v46  ;;  %v1842_v61 = vld [vmem:[%s4597_s5 + $0x18] sm:$0xff] }
 0x2ca   :  { %v1535_v49 = vld [vmem:[#allocation2 + $0x1c0] sm:$0xff] }
 0x2cb   :  { %1471 = vst.msk [vmem:[#allocation2 + $0x1d8] sm:$0xff] %vm38_vm2, %v1406_v42  ;;  %v1767_v59 = vadd.f32 %v4006_v26, %v1535_v49  ;;  %v3110_v37 = vpack.i.bf16 %v1799_v56, %v1782_v2  ;;  %v1751_v42 = vadd.f32 %v4010_v33, %v1519_v57  ;;  %2966 = vmatprep.subr.bf16.mxu0 %v2965_v7  ;;  %v1311_v56 = vld [vmem:[#allocation2 + $0xe0] sm:$0xff]  ;;  %v1843_v2 = vld [vmem:[%s4597_s5 + $0x20] sm:$0xff] }
 0x2cc   :  { %v1168_v8 = vpop.xlane.xlu0 %1167  ;;  %3101 = vperm.xlu1 %3024, %v3100_v19   ;;  %v1860_v33 = vld [vmem:[%s4597_s5 + $0xa8] sm:$0xff]  ;;  %v2971_v48 = vpack.c.bf16 %v1844_v0, %v1843_v2 }
 0x2cd   :  { %v1372_v14 = vmax.f32 %v1308_v52, %v1168_v8  ;;  %v1831_v13 = vmax.f32 %v1767_v59, 0.0  ;;  %v1783_v52 = vmax.f32 %v1719_v12, 0.0  ;;  %v1862_v12 = vld [vmem:[%s4597_s5 + $0xb8] sm:$0xff] }
 0x2ce   :  { %v1506_v26 = vld [vmem:[#allocation2 + $0xd8] sm:$0xff] }
 0x2cf   :  { %1437 = vst.msk [vmem:[#allocation2 + $0xc8] sm:$0xff] %vm38_vm2, %v1372_v14  ;;  %v3115_v6 = vpack.i.bf16 %v1831_v13, %v1814_v25  ;;  %v1738_v15 = vadd.f32 %v4026_v4, %v1506_v26  ;;  %v1815_v25 = vmax.f32 %v1751_v42, 0.0  ;;  %v1312_v42 = vld [vmem:[#allocation2 + $0xe8] sm:$0xff] }
 0x2d0   :  { %v1264_v45 = vpop.xlane.xlu0 %1263  ;;  %3111 = vperm.xlu1 %3024, %v3110_v37   ;;  %v1343_v37 = vld [vmem:[#allocation2 + $0x1e0] sm:$0xff] }
 0x2d1   :  { %v1404_v38 = vmax.f32 %v1340_v28, %v1264_v45  ;;  %3116 = vperm.xlu0 %3023, %v3115_v6   ;;  %v1802_v39 = vmax.f32 %v1738_v15, 0.0  ;;  %v1859_v28 = vld [vmem:[%s4597_s5 + $0xa0] sm:$0xff] }
 0x2d2   :  { %v1538_v62 = vld [vmem:[#allocation2 + $0x1d8] sm:$0xff]  ;;  %v2969_v13 = vpack.c.bf16 %v1860_v33, %v1859_v28 }
 0x2d3   :  { %1469 = vst.msk [vmem:[#allocation2 + $0x1c8] sm:$0xff] %vm38_vm2, %v1404_v38  ;;  %v3120_v9 = vpack.i.bf16 %v1802_v39, %v1785_v10  ;;  %v1770_v40 = vadd.f32 %v4026_v4, %v1538_v62  ;;  %v1841_v4 = vld [vmem:[%s4597_s5 + $0x10] sm:$0xff]  ;;  %v1756_v38 = vadd.f32 %v4041_v18, %v1524_v11  ;;  %v1314_v10 = vld [vmem:[#allocation2 + $0xf8] sm:$0xff]  ;;  %v1491_v11 = vld [vmem:[#allocation2 + $0x60] sm:$0xff] }
 0x2d4   :  { %v1183_v22 = vpop.xlane.xlu0 %1182  ;;  %v2967_v5 = vpack.c.bf16 %v1842_v61, %v1841_v4  ;;  %v1861_v18 = vld [vmem:[%s4597_s5 + $0xb0] sm:$0xff] }
 0x2d5   :  { %v1377_v44 = vmax.f32 %v1313_v1, %v1183_v22  ;;  %3121 = vperm.xlu1 %3024, %v3120_v9   ;;  %v1834_v63 = vmax.f32 %v1770_v40, 0.0  ;;  %v1346_v40 = vld [vmem:[#allocation2 + $0x1f8] sm:$0xff]  ;;  %v1820_v22 = vmax.f32 %v1756_v38, 0.0  ;;  %v2973_v29 = vpack.c.bf16 %v1862_v12, %v1861_v18  ;;  %v1845_v4 = vld [vmem:[%s4597_s5 + $0x30] sm:$0xff]  ;;  %v1866_v38 = vld [vmem:[%s4597_s5 + $0xd8] sm:$0xff] }
 0x2d6   :  { %v1504_v31 = vld [vmem:[#allocation2 + $0xc8] sm:$0xff]  ;;  %2968 = vmatpush3.bf16.msra.mxu0 %v2967_v5  ;;  %v1852_v12 = vld [vmem:[%s4597_s5 + $0x68] sm:$0xff] }
 0x2d7   :  { %1442 = vst.msk [vmem:[#allocation2 + $0xf0] sm:$0xff] %vm38_vm2, %v1377_v44  ;;  %v3125_v43 = vpack.i.bf16 %v1834_v63, %v1817_v21  ;;  %v1736_v58 = vadd.f32 %v4012_v34, %v1504_v31  ;;  %2970 = vmatprep.subr.bf16.mxu0 %v2969_v13  ;;  %v1722_v44 = vadd.f32 %v4030_v54, %v1490_v47  ;;  %v1522_v21 = vld [vmem:[#allocation2 + $0x158] sm:$0xff]  ;;  %v1344_v13 = vld [vmem:[#allocation2 + $0x1e8] sm:$0xff] }
 0x2d8   :  { %v1279_v32 = vpop.xlane.xlu0 %1278  ;;  %v1754_v7 = vadd.f32 %v4030_v54, %v1522_v21  ;;  %v1863_v54 = vld [vmem:[%s4597_s5 + $0xc0] sm:$0xff] }
 0x2d9   :  { %v1409_v16 = vmax.f32 %v1345_v50, %v1279_v32  ;;  %3126 = vperm.xlu0 %3023, %v3125_v43   ;;  %v1800_v19 = vmax.f32 %v1736_v58, 0.0  ;;  %v1846_v50 = vld [vmem:[%s4597_s5 + $0x38] sm:$0xff]  ;;  %v1786_v58 = vmax.f32 %v1722_v44, 0.0  ;;  %v4227_v32 = vpop.permute.xlu1 %1610  ;;  %v1868_v44 = vld [vmem:[%s4597_s5 + $0xe8] sm:$0xff]  ;;  %v1851_v21 = vld [vmem:[%s4597_s5 + $0x60] sm:$0xff] }
 0x2da   :  { %v1536_v49 = vld [vmem:[#allocation2 + $0x1c8] sm:$0xff]  ;;  %2972 = vmatpush3.bf16.msra.mxu0 %v2971_v48  ;;  %v2975_v61 = vpack.c.bf16 %v1846_v50, %v1845_v4  ;;  %v1725_v33 = vadd.f32 %v4227_v32, %v1493_v53  ;;  %v2987_v4 = vpack.c.bf16 %v1852_v12, %v1851_v21 }
 0x2db   :  { %1474 = vst.msk [vmem:[#allocation2 + $0x1f0] sm:$0xff] %vm38_vm2, %v1409_v16  ;;  %v3130_v59 = vpack.i.bf16 %v1800_v19, %v1783_v52  ;;  %v1768_v8 = vadd.f32 %v4012_v34, %v1536_v49  ;;  %2974 = vmatprep.subr.bf16.mxu0 %v2973_v29  ;;  %v1847_v49 = vld [vmem:[%s4597_s5 + $0x40] sm:$0xff] }
 0x2dc   :  { %v1177_v14 = vpop.xlane.xlu0 %1176  ;;  %v1789_v48 = vmax.f32 %v1725_v33, 0.0  ;;  %v2560_v33 = vld [vmem:[%s4599_s7 + $0x10] sm:$0xff] }
 0x2dd   :  { %v1375_v34 = vmax.f32 %v1311_v56, %v1177_v14  ;;  %3131 = vperm.xlu1 %3024, %v3130_v59   ;;  %v1832_v41 = vmax.f32 %v1768_v8, 0.0  ;;  %v1864_v56 = vld [vmem:[%s4597_s5 + $0xc8] sm:$0xff]  ;;  %v1818_v8 = vmax.f32 %v1754_v7, 0.0 }
 0x2de   :  { %v1509_v26 = vld [vmem:[#allocation2 + $0xf0] sm:$0xff]  ;;  %2976 = vmatpush3.bf16.msra.mxu0 %v2975_v61  ;;  %v2977_v28 = vpack.c.bf16 %v1864_v56, %v1863_v54 }
 0x2df   :  { %1440 = vst.msk [vmem:[#allocation2 + $0xe0] sm:$0xff] %vm38_vm2, %v1375_v34  ;;  %v3135_v55 = vpack.i.bf16 %v1832_v41, %v1815_v25  ;;  %v1741_v24 = vadd.f32 %v4045_v3, %v1509_v26 }
 0x2e0   :  { %v1273_v6 = vpop.xlane.xlu0 %1272  ;;  %2978 = vmatprep.subr.bf16.mxu0 %v2977_v28  ;;  %v2558_v28 = vld [vmem:[%s4599_s7] sm:$0xff] }
 0x2e1   :  { %v1407_v15 = vmax.f32 %v1343_v37, %v1273_v6  ;;  %3136 = vperm.xlu0 %3023, %v3135_v55   ;;  %v1805_v45 = vmax.f32 %v1741_v24, 0.0  ;;  %v1615_v55 = vpop.permute.xlu1 %1614  ;;  %v1494_v6 = vld [vmem:[#allocation2 + $0x78] sm:$0xff] }
 0x2e2   :  { %v1541_v39 = vld [vmem:[#allocation2 + $0x1f0] sm:$0xff] }
 0x2e3   :  { %1472 = vst.msk [vmem:[#allocation2 + $0x1e0] sm:$0xff] %vm38_vm2, %v1407_v15  ;;  %v3140_v1 = vpack.i.bf16 %v1805_v45, %v1788_v23  ;;  %v1773_v62 = vadd.f32 %v4045_v3, %v1541_v39  ;;  %v1526_v15 = vld [vmem:[#allocation2 + $0x178] sm:$0xff]  ;;  %v1723_v23 = vadd.f32 %v4036_v17, %v1491_v11  ;;  %v1865_v45 = vld [vmem:[%s4597_s5 + $0xd0] sm:$0xff]  ;;  %v1726_v39 = vadd.f32 %v1615_v55, %v1494_v6  ;;  %v2567_v11 = vld [vmem:[%s4599_s7 + $0x48] sm:$0xff] }
 0x2e4   :  { %v1186_v20 = vpop.xlane.xlu0 %1185  ;;  %v2569_v6 = vld [vmem:[%s4599_s7 + $0x58] sm:$0xff] }
 0x2e5   :  { %v1378_v9 = vmax.f32 %v1314_v10, %v1186_v20  ;;  %3141 = vperm.xlu1 %3024, %v3140_v1   ;;  %v1837_v57 = vmax.f32 %v1773_v62, 0.0  ;;  %v1849_v10 = vld [vmem:[%s4597_s5 + $0x50] sm:$0xff]  ;;  %v1523_v1 = vld [vmem:[#allocation2 + $0x160] sm:$0xff]  ;;  %v2981_v62 = vpack.c.bf16 %v1866_v38, %v1865_v45  ;;  %v1850_v20 = vld [vmem:[%s4597_s5 + $0x58] sm:$0xff]  ;;  %v1790_v50 = vmax.f32 %v1726_v39, 0.0 }
 0x2e6   :  { %v1507_v63 = vld [vmem:[#allocation2 + $0xe0] sm:$0xff]  ;;  %v1755_v29 = vadd.f32 %v4036_v17, %v1523_v1 }
 0x2e7   :  { %1443 = vst.msk [vmem:[#allocation2 + $0xf8] sm:$0xff] %vm38_vm2, %v1378_v9  ;;  %v3145_v3 = vpack.i.bf16 %v1837_v57, %v1820_v22  ;;  %v1739_v46 = vadd.f32 %v4033_v51, %v1507_v63  ;;  %v1758_v9 = vadd.f32 %v1615_v55, %v1526_v15  ;;  %v2983_v22 = vpack.c.bf16 %v1850_v20, %v1849_v10  ;;  %v1867_v57 = vld [vmem:[%s4597_s5 + $0xe0] sm:$0xff]  ;;  %v2571_v45 = vld [vmem:[%s4599_s7 + $0x68] sm:$0xff] }
 0x2e8   :  { %v1282_v31 = vpop.xlane.xlu0 %1281  ;;  %v2985_v18 = vpack.c.bf16 %v1868_v44, %v1867_v57  ;;  %v2135_v44 = vand.u32 127, %v1545_v35 }
 0x2e9   :  { %v1410_v43 = vmax.f32 %v1346_v40, %v1282_v31  ;;  %3146 = vperm.xlu0 %3023, %v3145_v3   ;;  %v1803_v5 = vmax.f32 %v1739_v46, 0.0  ;;  %v1787_v3 = vmax.f32 %v1723_v23, 0.0  ;;  %v1822_v7 = vmax.f32 %v1758_v9, 0.0  ;;  %v2570_v23 = vld [vmem:[%s4599_s7 + $0x60] sm:$0xff] }
 0x2ea   :  { %v1539_v16 = vld [vmem:[#allocation2 + $0x1e0] sm:$0xff]  ;;  %v3012_v38 = vpack.c.bf16 %v2571_v45, %v2570_v23  ;;  %v2147_v12 = vadd.s32 4294967280, %v2135_v44 }
 0x2eb   :  { %1475 = vst.msk [vmem:[#allocation2 + $0x1f8] sm:$0xff] %vm38_vm2, %v1410_v43  ;;  %v3150_v52 = vpack.i.bf16 %v1803_v5, %v1786_v58  ;;  %v1771_v19 = vadd.f32 %v4033_v51, %v1539_v16  ;;  %v1848_v51 = vld [vmem:[%s4597_s5 + $0x48] sm:$0xff]  ;;  %v1525_v5 = vld [vmem:[#allocation2 + $0x170] sm:$0xff]  ;;  %v1819_v16 = vmax.f32 %v1755_v29, 0.0  ;;  %v2175_v29 = vadd.s32 4294967248, %v2135_v44 }
 0x2ec   :  { %v1180_v59 = vpop.xlane.xlu0 %1179  ;;  %v2979_v25 = vpack.c.bf16 %v1848_v51, %v1847_v49  ;;  %v2559_v51 = vld [vmem:[%s4599_s7 + $0x8] sm:$0xff]  ;;  %v2150_v35 = vsub.s32 %v2147_v12, %v3402_v36 }
 0x2ed   :  { %v1376_v2 = vmax.f32 %v1312_v42, %v1180_v59  ;;  %3151 = vperm.xlu1 %3024, %v3150_v52   ;;  %v1835_v14 = vmax.f32 %v1771_v19, 0.0  ;;  %v1757_v42 = vadd.f32 %v4227_v32, %v1525_v5  ;;  %v3180_v19 = vpack.i.bf16 %v1822_v7, %v1790_v50  ;;  %v1853_v32 = vld [vmem:[%s4597_s5 + $0x70] sm:$0xff]  ;;  %v1854_v59 = vld [vmem:[%s4597_s5 + $0x78] sm:$0xff] }
 0x2ee   :  { %v1510_v0 = vld [vmem:[#allocation2 + $0xf8] sm:$0xff]  ;;  %2980 = vmatpush3.bf16.msra.mxu0 %v2979_v25  ;;  %v2561_v25 = vld [vmem:[%s4599_s7 + $0x18] sm:$0xff]  ;;  %v2182_v50 = vadd.s32 4294967240, %v2135_v44  ;;  %v2203_v7 = vadd.s32 4294967216, %v2135_v44 }
 0x2ef   :  { %1441 = vst.msk [vmem:[#allocation2 + $0xe8] sm:$0xff] %vm38_vm2, %v1376_v2  ;;  %v3155_v34 = vpack.i.bf16 %v1835_v14, %v1818_v8  ;;  %v1742_v41 = vadd.f32 %v4101_v27, %v1510_v0  ;;  %2982 = vmatprep.subr.bf16.mxu0 %v2981_v62  ;;  %v1821_v56 = vmax.f32 %v1757_v42, 0.0  ;;  %v2991_v8 = vpack.c.bf16 %v1854_v59, %v1853_v32  ;;  %v2562_v0 = vld [vmem:[%s4599_s7 + $0x20] sm:$0xff] }
 0x2f0   :  { %v1276_v30 = vpop.xlane.xlu0 %1275  ;;  %v3243_v2 = vmov 0.0|0.0   ;;  %v2994_v14 = vpack.c.bf16 %v2559_v51, %v2558_v28  ;;  %v4376_v32 = vsub.s32 %v2203_v7, %v3402_v36 }
 0x2f1   :  { %v1408_v37 = vmax.f32 %v1344_v13, %v1276_v30  ;;  %3156 = vperm.xlu0 %3023, %v3155_v34   ;;  %v1806_v26 = vmax.f32 %v1742_v41, 0.0  ;;  %2993 = vmatprep.subr.bf16.mxu1 %v3243_v2  ;;  %v2997_v13 = vpack.c.bf16 %v2561_v25, %v2560_v33  ;;  %v2563_v34 = vld [vmem:[%s4599_s7 + $0x28] sm:$0xff]  ;;  %v2564_v30 = vld [vmem:[%s4599_s7 + $0x30] sm:$0xff] }
 0x2f2   :  { %v1542_v63 = vld [vmem:[#allocation2 + $0x1f8] sm:$0xff]  ;;  %2984 = vmatpush3.bf16.msra.mxu0 %v2983_v22  ;;  %2995 = vmatpush3.bf16.msra.mxu1 %v2994_v14  ;;  %v3000_v41 = vpack.c.bf16 %v2563_v34, %v2562_v0  ;;  %v2231_v14 = vadd.s32 4294967184, %v2135_v44  ;;  %v2217_v0 = vadd.s32 4294967200, %v2135_v44  ;;  %v2238_v34 = vadd.s32 4294967176, %v2135_v44 }
 0x2f3   :  { %1473 = vst.msk [vmem:[#allocation2 + $0x1e8] sm:$0xff] %vm38_vm2, %v1408_v37  ;;  %v3160_v24 = vpack.i.bf16 %v1806_v26, %v1789_v48  ;;  %2986 = vmatprep.subr.bf16.mxu0 %v2985_v18  ;;  %v1774_v58 = vadd.f32 %v4101_v27, %v1542_v63  ;;  %v1870_v27 = vld [vmem:[%s4597_s5 + $0xf8] sm:$0xff]  ;;  %2996 = vmatprep.subr.bf16.mxu1 %v3243_v2  ;;  %v2566_v26 = vld [vmem:[%s4599_s7 + $0x40] sm:$0xff]  ;;  %v2140_v18 = vadd.s32 4294967288, %v2135_v44  ;;  %vm2482_vm2 = vcmask 1041409  }
 0x2f4   :  { %v2565_v48 = vld [vmem:[%s4599_s7 + $0x38] sm:$0xff]  ;;  %v3006_v55 = vpack.c.bf16 %v2567_v11, %v2566_v26 }
 0x2f5   :  { %3161 = vperm.xlu1 %3024, %v3160_v24   ;;  %v1838_v54 = vmax.f32 %v1774_v58, 0.0  ;;  %v3003_v37 = vpack.c.bf16 %v2565_v48, %v2564_v30  ;;  %v2568_v24 = vld [vmem:[%s4599_s7 + $0x50] sm:$0xff]  ;;  %v2143_v58 = vsub.s32 %v2140_v18, %v3402_v36 }
 0x2f6   :  { %v1508_v47 = vld [vmem:[#allocation2 + $0xe8] sm:$0xff]  ;;  %2988 = vmatpush3.bf16.msra.mxu0 %v2987_v4  ;;  %2998 = vmatpush3.bf16.msra.mxu1 %v2997_v13  ;;  %v3009_v15 = vpack.c.bf16 %v2569_v6, %v2568_v24  ;;  %v2161_v4 = vadd.s32 4294967264, %v2135_v44 }
 0x2f7   :  { %v1740_v40 = vadd.f32 %v4038_v60, %v1508_v47  ;;  %v3175_v49 = vpack.i.bf16 %v1838_v54, %v1821_v56  ;;  %2999 = vmatprep.subr.bf16.mxu1 %v3243_v2  ;;  %v4370_v54 = vsub.s32 %v2182_v50, %v3402_v36  ;;  %v2210_v56 = vadd.s32 4294967208, %v2135_v44 }
 0x2f8   :  { %v3027_v39 = vpop.permute.xlu0 %3026 }
 0x2f9   :  { %v1804_v46 = vmax.f32 %v1740_v40, 0.0  ;;  %v4384_v13 = vsub.s32 %v2210_v56, %v3402_v36 }
 0x2fa   :  { %v1540_v31 = vld [vmem:[#allocation2 + $0x1e8] sm:$0xff]  ;;  %3001 = vmatpush3.bf16.msra.mxu1 %v3000_v41 }
 0x2fb   :  { %v3165_v61 = vpack.i.bf16 %v1804_v46, %v1787_v3  ;;  %v1772_v43 = vadd.f32 %v4038_v60, %v1540_v31  ;;  %v1869_v60 = vld [vmem:[%s4597_s5 + $0xf0] sm:$0xff]  ;;  %3002 = vmatprep.subr.bf16.mxu1 %v3243_v2  ;;  %v2154_v3 = vadd.s32 4294967272, %v2135_v44  ;;  %v2168_v46 = vadd.s32 4294967256, %v2135_v44 }
 0x2fc   :  { %v2989_v53 = vpack.c.bf16 %v1870_v27, %v1869_v60  ;;  %v4335_v1 = vpop.permute.xlu0 %3036  ;;  %v2196_v31 = vadd.s32 4294967224, %v2135_v44  ;;  %v3028_v60 = vunpack.i.l.bf16 %v3027_v39 }
 0x2fd   :  { %3166 = vperm.xlu1 %3024, %v3165_v61   ;;  %v1836_v52 = vmax.f32 %v1772_v43, 0.0  ;;  %v2138_v61 = vsub.s32 %v2135_v44, %v3402_v36  ;;  %v2189_v43 = vadd.s32 4294967232, %v2135_v44  ;;  %v4354_v5 = vsub.s32 %v2154_v3, %v3402_v36 }
 0x2fe   :  { %2990 = vmatprep.subr.bf16.mxu0 %v2989_v53  ;;  %3004 = vmatpush3.bf16.msra.mxu1 %v3003_v37  ;;  %v4357_v42 = vsub.s32 %v2168_v46, %v3402_v36  ;;  %v4373_v27 = vsub.s32 %v2196_v31, %v3402_v36  ;;  %v3038_v25 = vunpack.i.l.bf16 %v4335_v1  ;;  %v3039_v48 = vunpack.i.h.bf16 %v4335_v1 }
 0x2ff   :  { %v3170_v17 = vpack.i.bf16 %v1836_v52, %v1819_v16  ;;  %2992 = vmatpush3.bf16.msra.mxu0 %v2991_v8  ;;  %3005 = vmatprep.subr.bf16.mxu1 %v3243_v2  ;;  %v4380_v28 = vsub.s32 %v2189_v43, %v3402_v36  ;;  %v2139_v30 = vrot.slane %v3028_v60, %v2138_v61 }
 0x300   :  { %v4337_v20 = vpop.permute.xlu0 %3046  ;;  %v2331_v1 = vrot.slane %v3038_v25, %v2143_v58  ;;  %v4405_v46 = vsub.s32 %v2238_v34, %v3402_v36 }
 0x301   :  { %3181 = vperm.xlu1 %3024, %v3180_v19   ;;  %3171 = vperm.xlu0 %3023, %v3170_v17   ;;  %v4364_v19 = vsub.s32 %v2175_v29, %v3402_v36  ;;  %v4367_v17 = vsub.s32 %v2161_v4, %v3402_v36  ;;  %v2415_v29 = vrot.slane %v3039_v48, %v2150_v35 }
 0x302   :  { %3007 = vmatpush3.bf16.msra.mxu1 %v3006_v55  ;;  %v3048_v55 = vunpack.i.l.bf16 %v4337_v20 }
 0x303   :  { %3008 = vmatprep.subr.bf16.mxu1 %v3243_v2 }
 0x304   :  { %v2336_v4 = vrot.slane %v3048_v55, %v2150_v35 }
 0x305   :  { %3176 = vperm.xlu0 %3023, %v3175_v49   ;;  %v3029_v49 = vunpack.i.h.bf16 %v3027_v39  ;;  %v4395_v39 = vsub.s32 %v2231_v14, %v3402_v36 }
 0x306   :  { %3010 = vmatpush3.bf16.msra.mxu1 %v3009_v15 }
 0x307   :  { %3011 = vmatprep.subr.bf16.mxu1 %v3243_v2  ;;  %v2144_v41 = vrot.slane %v3029_v49, %v2143_v58 }
 0x309   :  { %v2146_v18 = vsel %vm2145_vm3, %v2144_v41, %v2139_v30 }
 0x30a   :  { %3013 = vmatpush3.bf16.msra.mxu1 %v3012_v38 }
 0x30b   :  { %3014 = vmatprep.subr.bf16.mxu1 %v3243_v2  ;;  %v2224_v2 = vadd.s32 4294967192, %v2135_v44  ;;  %v4400_v44 = vsub.s32 %v2217_v0, %v3402_v36 }
 0x30d   :  { %v4392_v38 = vsub.s32 %v2224_v2, %v3402_v36 }
 0x32f   :  { %v4331_v10 = vpop.permute.xlu1 %3031 }
 0x330   :  { %v3034_v53 = vunpack.i.h.bf16 %v4331_v10 }
 0x332   :  { %v2327_v24 = vrot.slane %v3034_v53, %v2138_v61 }
 0x333   :  { %v4333_v47 = vpop.permute.xlu1 %3041  ;;  %v3052_v9 = vpop.permute.xlu0 %3051 }
 0x334   :  { %v3054_v51 = vunpack.i.h.bf16 %v3052_v9  ;;  %v3053_v33 = vunpack.i.l.bf16 %v3052_v9  ;;  %v3043_v37 = vunpack.i.l.bf16 %v4333_v47  ;;  %v3033_v9 = vunpack.i.l.bf16 %v4331_v10 }
 0x335   :  { %v3044_v12 = vunpack.i.h.bf16 %v4333_v47  ;;  %v2332_v50 = vsel %vm2145_vm3, %v2331_v1, %v2327_v24 }
 0x336   :  { %v2252_v23 = vrot.slane %v3054_v51, %v2143_v58  ;;  %v2248_v45 = vrot.slane %v3053_v33, %v2138_v61  ;;  %v2151_v3 = vrot.slane %v3043_v37, %v2150_v35 }
 0x337   :  { %v3057_v62 = vpop.permute.xlu1 %3056  ;;  %v4341_v22 = vpop.permute.xlu0 %3066  ;;  %v2262_v60 = vrot.slane %v3044_v12, %v4354_v5 }
 0x338   :  { %v3059_v59 = vunpack.i.h.bf16 %v3057_v62  ;;  %v3058_v8 = vunpack.i.l.bf16 %v3057_v62  ;;  %v3049_v62 = vunpack.i.h.bf16 %v4337_v20  ;;  %v2253_v10 = vsel %vm2145_vm3, %v2252_v23, %v2248_v45 }
 0x339   :  { %v3069_v31 = vunpack.i.h.bf16 %v4341_v22  ;;  %v2153_v53 = vsel %vm2152_vm4, %v2151_v3, %v2146_v18  ;;  %v3068_v51 = vunpack.i.l.bf16 %v4341_v22 }
 0x33a   :  { %v2410_v6 = vrot.slane %v3059_v59, %v2143_v58  ;;  %v2406_v15 = vrot.slane %v3058_v8, %v2138_v61  ;;  %v2420_v36 = vrot.slane %v3049_v62, %v4354_v5  ;;  %v2257_v58 = vrot.slane %v3033_v9, %v2150_v35 }
 0x33b   :  { %v4339_v40 = vpop.permute.xlu1 %3061  ;;  %v4346_v21 = vpop.permute.xlu0 %3076  ;;  %v2337_v8 = vsel %vm2152_vm4, %v2336_v4, %v2332_v50  ;;  %v2435_v35 = vrot.slane %v3069_v31, %v4364_v19 }
 0x33c   :  { %v2411_v20 = vsel %vm2145_vm3, %v2410_v6, %v2406_v15  ;;  %v3079_v7 = vunpack.i.h.bf16 %v4346_v21  ;;  %v3078_v61 = vunpack.i.l.bf16 %v4346_v21  ;;  %v2258_v21 = vsel %vm2152_vm4, %v2257_v58, %v2253_v10 }
 0x33d   :  { %v2416_v59 = vsel %vm2152_vm4, %v2415_v29, %v2411_v20  ;;  %v3064_v14 = vunpack.i.h.bf16 %v4339_v40  ;;  %v2351_v6 = vrot.slane %v3068_v51, %v4357_v42  ;;  %v2263_v62 = vsel %vm2159_vm5, %v2262_v60, %v2258_v21 }
 0x33e   :  { %v2425_v25 = vrot.slane %v3079_v7, %v4367_v17  ;;  %v2341_v0 = vrot.slane %v3078_v61, %v4354_v5  ;;  %v2421_v41 = vsel %vm2159_vm5, %v2420_v36, %v2416_v59  ;;  %vm3244_vm3 = vmmov 0  }
 0x33f   :  { %v4343_v57 = vpop.permute.xlu1 %3071  ;;  %v4359_v16 = vpop.permute.xlu0 %3086 }
 0x340   :  { %v3074_v33 = vunpack.i.h.bf16 %v4343_v57  ;;  %v3073_v2 = vunpack.i.l.bf16 %v4343_v57  ;;  %v3063_v57 = vunpack.i.l.bf16 %v4339_v40  ;;  %v3089_v37 = vunpack.i.h.bf16 %v4359_v16 }
 0x341   :  { %v2342_v1 = vsel %vm2159_vm5, %v2341_v0, %v2337_v8  ;;  %v2426_v40 = vsel %vm2166_vm6, %v2425_v25, %v2421_v41 }
 0x342   :  { %v2267_v15 = vrot.slane %v3074_v33, %v4367_v17  ;;  %v2158_v23 = vrot.slane %v3073_v2, %v4354_v5  ;;  %v2172_v3 = vrot.slane %v3063_v57, %v4357_v42  ;;  %v2440_v29 = vrot.slane %v3089_v37, %v4370_v54 }
 0x343   :  { %v4348_v63 = vpop.permute.xlu1 %3081  ;;  %v3097_v26 = vpop.permute.xlu0 %3096 }
 0x344   :  { %v3099_v56 = vunpack.i.h.bf16 %v3097_v26  ;;  %v3098_v49 = vunpack.i.l.bf16 %v3097_v26  ;;  %v3088_v26 = vunpack.i.l.bf16 %v4359_v16  ;;  %v3084_v45 = vunpack.i.h.bf16 %v4348_v63 }
 0x345   :  { %v3083_v16 = vunpack.i.l.bf16 %v4348_v63  ;;  %v2160_v20 = vsel %vm2159_vm5, %v2158_v23, %v2153_v53  ;;  %v2268_v10 = vsel %vm2166_vm6, %v2267_v15, %v2263_v62 }
 0x346   :  { %v2430_v30 = vrot.slane %v3099_v56, %v4357_v42  ;;  %v2346_v22 = vrot.slane %v3098_v49, %v4367_v17  ;;  %v2356_v4 = vrot.slane %v3088_v26, %v4364_v19  ;;  %v2282_v31 = vrot.slane %v3084_v45, %v4370_v54 }
 0x347   :  { %v4361_v52 = vpop.permute.xlu1 %3091 }
 0x348   :  { %v4413_v47 = vpop.permute.xlu0 %3106  ;;  %v3093_v48 = vunpack.i.l.bf16 %v4361_v52  ;;  %v3094_v55 = vunpack.i.h.bf16 %v4361_v52  ;;  %v2277_v52 = vrot.slane %v3064_v14, %v4364_v19  ;;  %v2347_v18 = vsel %vm2166_vm6, %v2346_v22, %v2342_v1 }
 0x349   :  { %v2431_v12 = vsel %vm2173_vm7, %v2430_v30, %v2426_v40  ;;  %v3109_v7 = vunpack.i.h.bf16 %v4413_v47  ;;  %v2352_v61 = vsel %vm2173_vm7, %v2351_v6, %v2347_v18  ;;  %v3108_v58 = vunpack.i.l.bf16 %v4413_v47 }
 0x34a   :  { %v2165_v5 = vrot.slane %v3093_v48, %v4367_v17  ;;  %v2272_v50 = vrot.slane %v3094_v55, %v4357_v42  ;;  %v2179_v17 = vrot.slane %v3083_v16, %v4364_v19  ;;  %v2436_v36 = vsel %vm2180_vm8, %v2435_v35, %v2431_v12 }
 0x34b   :  { %v4388_v11 = vpop.permute.xlu1 %3101  ;;  %v2455_v47 = vrot.slane %v3109_v7, %v4376_v32  ;;  %v2357_v25 = vsel %vm2180_vm8, %v2356_v4, %v2352_v61  ;;  %v2441_v0 = vsel %vm2187_vm9, %v2440_v29, %v2436_v36 }
 0x34c   :  { %v2167_v56 = vsel %vm2166_vm6, %v2165_v5, %v2160_v20  ;;  %v2273_v59 = vsel %vm2173_vm7, %v2272_v50, %v2268_v10  ;;  %v3104_v33 = vunpack.i.h.bf16 %v4388_v11  ;;  %v3103_v48 = vunpack.i.l.bf16 %v4388_v11 }
 0x34d   :  { %v2174_v14 = vsel %vm2173_vm7, %v2172_v3, %v2167_v56 }
 0x34e   :  { %v2297_v15 = vrot.slane %v3104_v33, %v4376_v32  ;;  %v2181_v1 = vsel %vm2180_vm8, %v2179_v17, %v2174_v14  ;;  %v2200_v50 = vrot.slane %v3103_v48, %v4373_v27 }
 0x34f   :  { %v4415_v43 = vpop.permute.xlu1 %3111 }
 0x350   :  { %v4430_v34 = vpop.permute.xlu0 %3116  ;;  %v3114_v49 = vunpack.i.h.bf16 %v4415_v43  ;;  %v3113_v60 = vunpack.i.l.bf16 %v4415_v43  ;;  %v2371_v43 = vrot.slane %v3108_v58, %v4373_v27 }
 0x351   :  { %v3118_v53 = vunpack.i.l.bf16 %v4430_v34  ;;  %v3119_v8 = vunpack.i.h.bf16 %v4430_v34  ;;  %v2278_v34 = vsel %vm2180_vm8, %v2277_v52, %v2273_v59 }
 0x352   :  { %v2287_v41 = vrot.slane %v3114_v49, %v4380_v28  ;;  %v2186_v30 = vrot.slane %v3113_v60, %v4370_v54  ;;  %v2283_v11 = vsel %vm2187_vm9, %v2282_v31, %v2278_v34 }
 0x353   :  { %v2361_v22 = vrot.slane %v3118_v53, %v4370_v54  ;;  %v2445_v57 = vrot.slane %v3119_v8, %v4380_v28 }
 0x354   :  { %v4440_v24 = vpop.permute.xlu1 %3121  ;;  %v2188_v16 = vsel %vm2187_vm9, %v2186_v30, %v2181_v1  ;;  %v2288_v52 = vsel %vm2194_vm10, %v2287_v41, %v2283_v11 }
 0x355   :  { %v3124_v23 = vunpack.i.h.bf16 %v4440_v24  ;;  %v3123_v40 = vunpack.i.l.bf16 %v4440_v24  ;;  %v2362_v18 = vsel %vm2187_vm9, %v2361_v22, %v2357_v25  ;;  %v2446_v5 = vsel %vm2194_vm10, %v2445_v57, %v2441_v0 }
 0x357   :  { %v2207_v10 = vrot.slane %v3123_v40, %v4376_v32 }
 0x358   :  { %v4450_v9 = vpop.permute.xlu0 %3126 }
 0x359   :  { %v3129_v62 = vunpack.i.h.bf16 %v4450_v9  ;;  %v3128_v12 = vunpack.i.l.bf16 %v4450_v9 }
 0x35b   :  { %v2460_v31 = vrot.slane %v3129_v62, %v4384_v13  ;;  %v2376_v61 = vrot.slane %v3128_v12, %v4376_v32 }
 0x35c   :  { %v3132_v63 = vpop.permute.xlu1 %3131 }
 0x35d   :  { %v3134_v19 = vunpack.i.h.bf16 %v3132_v63  ;;  %v3133_v21 = vunpack.i.l.bf16 %v3132_v63  ;;  %v2302_v63 = vrot.slane %v3124_v23, %v4384_v13 }
 0x35f   :  { %v2292_v37 = vrot.slane %v3134_v19, %v4373_v27  ;;  %v2193_v26 = vrot.slane %v3133_v21, %v4380_v28 }
 0x360   :  { %v3137_v42 = vpop.permute.xlu0 %3136 }
 0x361   :  { %v3139_v2 = vunpack.i.h.bf16 %v3137_v42  ;;  %v3138_v35 = vunpack.i.l.bf16 %v3137_v42  ;;  %v2293_v3 = vsel %vm2201_vm11, %v2292_v37, %v2288_v52 }
 0x362   :  { %v2298_v58 = vsel %vm2208_vm12, %v2297_v15, %v2293_v3 }
 0x363   :  { %v2450_v45 = vrot.slane %v3139_v2, %v4373_v27  ;;  %v2366_v54 = vrot.slane %v3138_v35, %v4380_v28  ;;  %v2195_v28 = vsel %vm2194_vm10, %v2193_v26, %v2188_v16  ;;  %v2303_v35 = vsel %vm2215_vm13, %v2302_v63, %v2298_v58 }
 0x364   :  { %v4474_v51 = vpop.permute.xlu1 %3141  ;;  %v2202_v36 = vsel %vm2201_vm11, %v2200_v50, %v2195_v28 }
 0x365   :  { %v2367_v20 = vsel %vm2194_vm10, %v2366_v54, %v2362_v18  ;;  %v2451_v9 = vsel %vm2201_vm11, %v2450_v45, %v2446_v5  ;;  %v3144_v7 = vunpack.i.h.bf16 %v4474_v51  ;;  %v3143_v49 = vunpack.i.l.bf16 %v4474_v51 }
 0x366   :  { %v2372_v42 = vsel %vm2201_vm11, %v2371_v43, %v2367_v20  ;;  %v2456_v56 = vsel %vm2208_vm12, %v2455_v47, %v2451_v9  ;;  %v2209_v2 = vsel %vm2208_vm12, %v2207_v10, %v2202_v36 }
 0x367   :  { %v2317_v21 = vrot.slane %v3144_v7, %v4395_v39  ;;  %v2228_v25 = vrot.slane %v3143_v49, %v4392_v38  ;;  %v2377_v34 = vsel %vm2208_vm12, %v2376_v61, %v2372_v42  ;;  %v2461_v41 = vsel %vm2215_vm13, %v2460_v31, %v2456_v56 }
 0x368   :  { %v4490_v55 = vpop.permute.xlu0 %3146  ;;  %v3245_v56 = vmov 0.0  }
 0x369   :  { %v3149_v59 = vunpack.i.h.bf16 %v4490_v55  ;;  %v3148_v47 = vunpack.i.l.bf16 %v4490_v55  ;;  %2958 = vmatprep.mubr.msk.f32.mxu1 %vm3244_vm3, %v3245_v56 }
 0x36b   :  { %v2475_v48 = vrot.slane %v3149_v59, %v4395_v39  ;;  %v2391_v23 = vrot.slane %v3148_v47, %v4392_v38 }
 0x36c   :  { %v3152_v6 = vpop.permute.xlu1 %3151 }
 0x36d   :  { %v3153_v29 = vunpack.i.l.bf16 %v3152_v6  ;;  %v3154_v17 = vunpack.i.h.bf16 %v3152_v6 }
 0x36f   :  { %v2214_v60 = vrot.slane %v3153_v29, %v4384_v13  ;;  %v2307_v33 = vrot.slane %v3154_v17, %v4400_v44 }
 0x370   :  { %v3157_v4 = vpop.permute.xlu0 %3156 }
 0x371   :  { %v3158_v27 = vunpack.i.l.bf16 %v3157_v4  ;;  %v3159_v8 = vunpack.i.h.bf16 %v3157_v4  ;;  %v2216_v0 = vsel %vm2215_vm13, %v2214_v60, %v2209_v2  ;;  %v2308_v26 = vsel %vm2222_vm14, %v2307_v33, %v2303_v35  ;;  %v2752_v60 = vld [vmem:[%s4598_s6] ss:$0 sm:$0xff] }
 0x373   :  { %v2381_v51 = vrot.slane %v3158_v27, %v4384_v13  ;;  %v2465_v57 = vrot.slane %v3159_v8, %v4400_v44  ;;  %v2573_v27 = vld [vmem:[%s4599_s7 + $0x78] sm:$0xff] }
 0x374   :  { %v4507_v24 = vpop.permute.xlu1 %3161 }
 0x375   :  { %v3163_v13 = vunpack.i.l.bf16 %v4507_v24  ;;  %v2382_v45 = vsel %vm2215_vm13, %v2381_v51, %v2377_v34  ;;  %v3164_v54 = vunpack.i.h.bf16 %v4507_v24  ;;  %v2466_v18 = vsel %vm2222_vm14, %v2465_v57, %v2461_v41 }
 0x377   :  { %v2235_v12 = vrot.slane %v3163_v13, %v4395_v39  ;;  %v2322_v50 = vrot.slane %v3164_v54, %v4405_v46 }
 0x37c   :  { %v3167_v53 = vpop.permute.xlu1 %3166 }
 0x37d   :  { %v3169_v19 = vunpack.i.h.bf16 %v3167_v53  ;;  %v3168_v32 = vunpack.i.l.bf16 %v3167_v53 }
 0x37f   :  { %v2312_v14 = vrot.slane %v3169_v19, %v4392_v38  ;;  %v2221_v43 = vrot.slane %v3168_v32, %v4400_v44  ;;  %v2753_v32 = vld [vmem:[%s4600_s8] ss:$0 sm:$0xff] }
 0x380   :  { %v3182_v30 = vpop.permute.xlu1 %3181  ;;  %v3172_v22 = vpop.permute.xlu0 %3171 }
 0x381   :  { %v2223_v37 = vsel %vm2222_vm14, %v2221_v43, %v2216_v0  ;;  %v3183_v55 = vunpack.i.l.bf16 %v3182_v30  ;;  %v3174_v6 = vunpack.i.h.bf16 %v3172_v22  ;;  %v3173_v15 = vunpack.i.l.bf16 %v3172_v22 }
 0x382   :  { %v2313_v1 = vsel %vm2229_vm15, %v2312_v14, %v2308_v26  ;;  %v2230_v11 = vsel %vm2229_vm15, %v2228_v25, %v2223_v37  ;;  %v3184_v40 = vunpack.i.h.bf16 %v3182_v30 }
 0x383   :  { %v2470_v62 = vrot.slane %v3174_v6, %v4392_v38  ;;  %v2386_v16 = vrot.slane %v3173_v15, %v4400_v44  ;;  %v2242_v3 = vrot.slane %v3183_v55, %v4405_v46  ;;  %v2318_v24 = vsel %vm2236_vm0, %v2317_v21, %v2313_v1 }
 0x384   :  { %v3177_v52 = vpop.permute.xlu0 %3176  ;;  %v2237_v38 = vsel %vm2236_vm0, %v2235_v12, %v2230_v11  ;;  %v2401_v20 = vrot.slane %v3184_v40, %v4405_v46  ;;  %v2323_v7 = vsel %vm2243_vm1, %v2322_v50, %v2318_v24 }
 0x385   :  { %v3179_v5 = vunpack.i.h.bf16 %v3177_v52  ;;  %v3178_v28 = vunpack.i.l.bf16 %v3177_v52  ;;  %v2387_v29 = vsel %vm2222_vm14, %v2386_v16, %v2382_v45  ;;  %v2471_v4 = vsel %vm2229_vm15, %v2470_v62, %v2466_v18 }
 0x386   :  { %v2392_v9 = vsel %vm2229_vm15, %v2391_v23, %v2387_v29  ;;  %v2476_v10 = vsel %vm2236_vm0, %v2475_v48, %v2471_v4  ;;  %v2244_v61 = vsel %vm2243_vm1, %v2242_v3, %v2237_v38 }
 0x387   :  { %v2480_v44 = vrot.slane %v3179_v5, %v4405_v46  ;;  %v2396_v63 = vrot.slane %v3178_v28, %v4395_v39  ;;  %v2572_v46 = vld [vmem:[%s4599_s7 + $0x70] sm:$0xff]  ;;  %s3246_s7 = smov [#allocation3]  }
 0x388   :  { %v3015_v42 = vpack.c.bf16 %v2573_v27, %v2572_v46  ;;  %s2658_s28 = sshll.u32 %s3246_s7, 4  ;;  %s2659_s28 = int_to_ptr.vmem [resolvable:$true] %s2658_s28 }
 0x389   :  { %v2397_v31 = vsel %vm2236_vm0, %v2396_v63, %v2392_v9  ;;  %v2481_v17 = vsel %vm2243_vm1, %v2480_v44, %v2476_v10  ;;  %s3217_s29 = scalar_lea.vmem %s2659_s28, 32  ;;  %p3222_p1 = scmp.lt.s32.totalorder %s2659_s28, %s2659_s28 }
 0x38a   :  { %v2484_v36 = vsel %vm2482_vm2, %v2481_v17, %v2323_v7  ;;  %v2402_v58 = vsel %vm2243_vm1, %v2401_v20, %v2397_v31  ;;  %3016 = vmatpush3.bf16.msra.mxu1 %v3015_v42  ;;  %p3218_p0 = scmp.ne.s32.totalorder %s2659_s28, %s3217_s29  ;;  %p3223_p2 = scmp.lt.s32.totalorder %s3217_s29, %s3217_s29 }
 0x38b   :  { %2551 = vmatprep.mubr.f32.mxu0 %v2484_v36  ;;  %v2483_v39 = vsel %vm2482_vm2, %v2402_v58, %v2244_v61 }
 0x38c   :  { %2552 = vmatmul.mubr.f32.vlgmr.msra.gmra.mrb[32].mxu0 %v2483_v39  ;;  %p3224_p3 = por %p3223_p2, %p3222_p1 }
 0x38e   :  { %p3225_p4 = pnand %p3224_p3, %p3218_p0 }
 0x45f   :  { %v2826_v49 = vpop.f32.mrb[32].mxu0 }
 0x460   :  { %v2827_v53 = vpop.f32.mrb[33].mxu0 }
 0x461   :  { %v2828_v59 = vadd.f32 %v2827_v53, %v2826_v49 }
 0x463   :  { %v2554_v8 = vadd.f32 %v2828_v59, %v2752_v60 }
 0x465   :  { %v2557_v19 = vmax.f32 %v2554_v8, 0.0 }
 0x467   :  { %2959 = vmatmul.mubr.f32.vlgmr.msra.gmra.mrb[32].mxu1 %v2557_v19 }
 0x53a   :  { %v2647_v21 = vpop.f32.mrb[32].mxu1 }
 0x53b   :  { %v2648_v33 = vadd.f32 %v2753_v32, %v2647_v21  ;;  %v2960_v2 = vpop.f32.mrb[33].mxu1 }
 0x53d   :  { %2651 = vst [vmem:[#allocation3] sm:$0x3] %v2648_v33 }
 0x53e   :  { %3228 = shalt.err (!%p3225_p4)
}
 0x53f   :  { %s3229_s1 = scalar_lea.hbm %s4601_s9, 32 }
 0x540   :  { %p3230_p5 = scmp.ne.s32.totalorder %s4601_s9, %s3229_s1  ;;  %p3233_p6 = scmp.lt.u32.totalorder %s3229_s1, %s4601_s9 }
 0x542   :  { %p3235_p7 = pnand %p3233_p6, %p3230_p5 }
 0x544   :  { %3238 = shalt.err (!%p3235_p7)
}
 0x545   :  { %2661 = dma.vmem_to_hbm [thread:$0]  %s2659_s28, 32, %s4601_s9, [#allocation4]  }
 0x546   :  { %3239 = dma.done.wait [#allocation4], 32  }
 0x547   :  { %3240 = vsyncadd [#allocation4], 4294967264 }
 0x548   :  { %2665 = vsyncpa [#allocation4], 1 }

</bundles_post_ra>
